<compile_context>
chip_gen: v5e
topology: v5e:2x2
jax: 0.10.0
libtpu: 0.0.40
codegen_flags: <defaults>
</compile_context>

<pallas_src>
import functools
import math

import numpy as np
import jax
import jax.numpy as jnp
from jax import lax
from jax.experimental import pallas as pl
from jax.experimental.pallas import tpu as pltpu

_VMEM_LIMIT = 32 * 1024 * 1024  # safe on all gens; raises v5e's 16 MiB default


# ---------------------------------------------------------------------------
# helpers
# ---------------------------------------------------------------------------
def _round_up(x, m):
    return (x + m - 1) // m * m


def _pick_row_tile(mp, pref=512, min_tiles=2):
    """Largest multiple-of-8 tile dividing mp, <= pref, and (when possible)
    leaving >= min_tiles blocks so a 'parallel' grid axis covers both v7x TCs."""
    cap = pref
    if min_tiles > 1 and mp // min_tiles >= 8:
        cap = min(cap, mp // min_tiles)
    best = 8
    for d in range(1, mp // 8 + 1):
        t = 8 * d
        if (mp // 8) % d == 0 and t <= cap:
            best = t
    return best


# ---------------------------------------------------------------------------
# kernels
# ---------------------------------------------------------------------------
def _qkv_dense_kernel(x_ref, w_ref, b_ref, o_ref):
    # x: (tm, Kp); w: (3, Kp, Hp) resident; b: (3, 1, Hp); o: (3, tm, Hp)
    x = x_ref[...]
    for t in range(3):
        y = jnp.dot(x, w_ref[t], preferred_element_type=jnp.float32) + b_ref[t]
        o_ref[t] = y.astype(o_ref.dtype)


def _dense_kernel(x_ref, w_ref, b_ref, o_ref, *, activation):
    # y = act(x @ W + b); W resident across the M grid.
    y = jnp.dot(x_ref[...], w_ref[...], preferred_element_type=jnp.float32)
    y = y + b_ref[...]
    if activation == "relu":
        y = jnp.maximum(y, 0.0)
    o_ref[...] = y.astype(o_ref.dtype)


def _dense_res_ln_kernel(x_ref, w_ref, b_ref, r_ref, g_ref, be_ref, o_ref, *,
                         valid_n, eps):
    # y = LayerNorm(x @ W + b + residual)  (LN statistics over the first
    # valid_n lanes only; padded lanes have zero gamma/beta so they emit 0).
    y = jnp.dot(x_ref[...], w_ref[...], preferred_element_type=jnp.float32)
    y = y + b_ref[...] + r_ref[...].astype(jnp.float32)
    n_full = y.shape[-1]
    if valid_n != n_full:
        col = lax.broadcasted_iota(jnp.int32, y.shape, 1)
        valid = col < valid_n
        y = jnp.where(valid, y, 0.0)
    u = jnp.sum(y, axis=-1, keepdims=True) * (1.0 / valid_n)
    d = y - u
    if valid_n != n_full:
        d = jnp.where(valid, d, 0.0)
    var = jnp.sum(d * d, axis=-1, keepdims=True) * (1.0 / valid_n)
    inv = lax.rsqrt(var + eps)
    o_ref[...] = (d * inv * g_ref[...] + be_ref[...]).astype(o_ref.dtype)


def _attention_kernel(q_ref, k_ref, v_ref, m_ref, o_ref, *, num_heads,
                      head_dim, hidden, scale, approx_recip):
    # Per batch element: all heads processed inside; output is lane-dense (S, Hp).
    q = q_ref[0]                              # (S, Hp)
    k = k_ref[0]
    v = v_ref[0]
    mask = m_ref[0].astype(jnp.float32)       # (1, S) additive mask
    seq = q.shape[0]
    hp = q.shape[-1]

    ctx_heads = []
    for h in range(num_heads):
        lo = h * head_dim
        qh = q[:, lo:lo + head_dim]
        kh = k[:, lo:lo + head_dim]
        vh = v[:, lo:lo + head_dim]
        # contract last dims -> no explicit transpose of K
        s = lax.dot_general(qh, kh, (((1,), (1,)), ((), ())),
                            preferred_element_type=jnp.float32) * scale
        s = s + mask
        s = s - jnp.max(s, axis=-1, keepdims=True)      # stable softmax
        p = jnp.exp(s)
        p = p * pl.reciprocal(jnp.sum(p, axis=-1, keepdims=True),
                              approx=approx_recip)
        ctx_heads.append(jnp.dot(p.astype(vh.dtype), vh,
                                 preferred_element_type=jnp.float32))
    if hp != hidden:                                     # zero the lane padding
        ctx_heads.append(jnp.zeros((seq, hp - hidden), jnp.float32))
    o_ref[0] = jnp.concatenate(ctx_heads, axis=-1).astype(o_ref.dtype)


# ---------------------------------------------------------------------------
# pallas_call wrappers
# ---------------------------------------------------------------------------
def _qkv_dense(x, w3, b3, *, tm):
    mp, kp = x.shape
    _, _, n = w3.shape
    return pl.pallas_call(
        _qkv_dense_kernel,
        out_shape=jax.ShapeDtypeStruct((3, mp, n), x.dtype),
        grid_spec=pltpu.PrefetchScalarGridSpec(
            num_scalar_prefetch=0,
            grid=(mp // tm,),
            in_specs=[
                pl.BlockSpec((tm, kp), lambda i: (i, 0)),
                pl.BlockSpec((3, kp, n), lambda i: (0, 0, 0)),   # resident
                pl.BlockSpec((3, 1, n), lambda i: (0, 0, 0)),
            ],
            out_specs=pl.BlockSpec((3, tm, n), lambda i: (0, i, 0)),
        ),
        compiler_params=pltpu.CompilerParams(
            dimension_semantics=("parallel",),
            vmem_limit_bytes=_VMEM_LIMIT),
    )(x, w3, b3)


def _dense(x, w, b, *, activation, tm):
    mp, kp = x.shape
    _, n = w.shape
    return pl.pallas_call(
        functools.partial(_dense_kernel, activation=activation),
        out_shape=jax.ShapeDtypeStruct((mp, n), x.dtype),
        grid_spec=pltpu.PrefetchScalarGridSpec(
            num_scalar_prefetch=0,
            grid=(mp // tm,),
            in_specs=[
                pl.BlockSpec((tm, kp), lambda i: (i, 0)),
                pl.BlockSpec((kp, n), lambda i: (0, 0)),         # resident
                pl.BlockSpec((1, n), lambda i: (0, 0)),
            ],
            out_specs=pl.BlockSpec((tm, n), lambda i: (i, 0)),
        ),
        compiler_params=pltpu.CompilerParams(
            dimension_semantics=("parallel",),
            vmem_limit_bytes=_VMEM_LIMIT),
    )(x, w, b)


def _dense_res_ln(x, w, b, residual, gamma, beta, *, valid_n, tm, eps=1e-12):
    mp, kp = x.shape
    _, n = w.shape
    return pl.pallas_call(
        functools.partial(_dense_res_ln_kernel, valid_n=valid_n, eps=eps),
        out_shape=jax.ShapeDtypeStruct((mp, n), x.dtype),
        grid_spec=pltpu.PrefetchScalarGridSpec(
            num_scalar_prefetch=0,
            grid=(mp // tm,),
            in_specs=[
                pl.BlockSpec((tm, kp), lambda i: (i, 0)),
                pl.BlockSpec((kp, n), lambda i: (0, 0)),         # resident
                pl.BlockSpec((1, n), lambda i: (0, 0)),
                pl.BlockSpec((tm, n), lambda i: (i, 0)),         # residual
                pl.BlockSpec((1, n), lambda i: (0, 0)),          # gamma
                pl.BlockSpec((1, n), lambda i: (0, 0)),          # beta
            ],
            out_specs=pl.BlockSpec((tm, n), lambda i: (i, 0)),
        ),
        compiler_params=pltpu.CompilerParams(
            dimension_semantics=("parallel",),
            vmem_limit_bytes=_VMEM_LIMIT),
    )(x, w, b, residual, gamma, beta)


def _attention(q, k, v, mask, *, num_heads, hidden, approx_recip):
    b, s, hp = q.shape
    dh = hidden // num_heads
    scale = 1.0 / math.sqrt(dh)
    return pl.pallas_call(
        functools.partial(_attention_kernel, num_heads=num_heads, head_dim=dh,
                          hidden=hidden, scale=scale, approx_recip=approx_recip),
        out_shape=jax.ShapeDtypeStruct((b, s, hp), q.dtype),
        grid_spec=pltpu.PrefetchScalarGridSpec(
            num_scalar_prefetch=0,
            grid=(b,),
            in_specs=[
                pl.BlockSpec((1, s, hp), lambda i: (i, 0, 0)),
                pl.BlockSpec((1, s, hp), lambda i: (i, 0, 0)),
                pl.BlockSpec((1, s, hp), lambda i: (i, 0, 0)),
                pl.BlockSpec((1, 1, s), lambda i: (i, 0, 0)),
            ],
            out_specs=pl.BlockSpec((1, s, hp), lambda i: (i, 0, 0)),
        ),
        compiler_params=pltpu.CompilerParams(
            dimension_semantics=("parallel",)),
    )(q, k, v, mask)


# ---------------------------------------------------------------------------
# encoder layer / stack
# ---------------------------------------------------------------------------
def _encoder_layer(x2d, mask, p, *, num_heads, H, Hp, B, S, M, Mp, tm,
                   approx_recip):
    # Fused Q/K/V projection: (3, Mp, Hp), weights resident.
    qkv = _qkv_dense(x2d, p["qkv_w"], p["qkv_b"], tm=tm)
    q, k, v = qkv[0], qkv[1], qkv[2]
    if Mp != M:
        q, k, v = q[:M], k[:M], v[:M]
    q = q.reshape(B, S, Hp)
    k = k.reshape(B, S, Hp)
    v = v.reshape(B, S, Hp)

    ctx = _attention(q, k, v, mask, num_heads=num_heads, hidden=H,
                     approx_recip=approx_recip)          # (B, S, Hp)
    ctx2d = ctx.reshape(M, Hp)
    if Mp != M:
        ctx2d = jnp.pad(ctx2d, ((0, Mp - M), (0, 0)))

    # SelfOutput: dense + residual + LayerNorm fused      (dropout = identity)
    attn_out = _dense_res_ln(ctx2d, p["ao_w"], p["ao_b"], x2d,
                             p["ao_ln_g"], p["ao_ln_b"], valid_n=H, tm=tm)
    # Intermediate: dense + ReLU
    inter = _dense(attn_out, p["i_w"], p["i_b"], activation="relu", tm=tm)
    # Output: dense + residual + LayerNorm fused          (dropout = identity)
    layer_out = _dense_res_ln(inter, p["o_w"], p["o_b"], attn_out,
                              p["o_ln_g"], p["o_ln_b"], valid_n=H, tm=tm)
    return layer_out


def mol_trans_encoder_forward(hidden_states, attention_mask, packed_params, *,
                              num_heads, compute_dtype=jnp.bfloat16,
                              tm_pref=512):
    B, S, H = hidden_states.shape
    Hp = _round_up(H, 128)
    M = B * S
    Mp = _round_up(M, 8)
    tm = _pick_row_tile(Mp, tm_pref)
    approx_recip = np.dtype(compute_dtype) != np.dtype(jnp.float32)

    # Single pad at entry; hidden state stays (Mp, Hp) across all layers.
    x2d = hidden_states.reshape(M, H).astype(compute_dtype)
    x2d = jnp.pad(x2d, ((0, Mp - M), (0, Hp - H)))
    mask = attention_mask.reshape(B, 1, S).astype(jnp.float32)

    for p in packed_params:
        x2d = _encoder_layer(x2d, mask, p, num_heads=num_heads, H=H, Hp=Hp,
                             B=B, S=S, M=M, Mp=Mp, tm=tm,
                             approx_recip=approx_recip)

    return x2d[:M, :H].astype(hidden_states.dtype).reshape(B, S, H)


# ---------------------------------------------------------------------------
# parameter packing (hoisted out of the forward; runs once)
# ---------------------------------------------------------------------------
def prepare_params(raw_params, H, I, compute_dtype):
    Hp, Ip = _round_up(H, 128), _round_up(I, 128)

    def pad_w(w, ko, no):
        return jnp.pad(w, ((0, ko - w.shape[0]), (0, no - w.shape[1]))
                       ).astype(compute_dtype)

    def pad_b(b, no):
        return jnp.pad(b.astype(jnp.float32), (0, no - b.shape[0])).reshape(1, no)

    packed = []
    for p in raw_params:
        packed.append({
            "qkv_w": jnp.stack([pad_w(p["q_w"], Hp, Hp),
                                pad_w(p["k_w"], Hp, Hp),
                                pad_w(p["v_w"], Hp, Hp)]),          # (3,Hp,Hp)
            "qkv_b": jnp.stack([pad_b(p["q_b"], Hp),
                                pad_b(p["k_b"], Hp),
                                pad_b(p["v_b"], Hp)]),              # (3,1,Hp)
            "ao_w": pad_w(p["ao_w"], Hp, Hp), "ao_b": pad_b(p["ao_b"], Hp),
            "ao_ln_g": pad_b(p["ao_ln_g"], Hp), "ao_ln_b": pad_b(p["ao_ln_b"], Hp),
            "i_w": pad_w(p["i_w"], Hp, Ip), "i_b": pad_b(p["i_b"], Ip),
            "o_w": pad_w(p["o_w"], Ip, Hp), "o_b": pad_b(p["o_b"], Hp),
            "o_ln_g": pad_b(p["o_ln_g"], Hp), "o_ln_b": pad_b(p["o_ln_b"], Hp),
        })
    return packed


def init_layer_params(key, H, I):
    ks = jax.random.split(key, 12)

    def w(k, fi, fo):   # stored transposed vs nn.Linear.weight
        return jax.random.normal(k, (fi, fo), jnp.float32) * 0.05

    def b(k, n):
        return jax.random.normal(k, (n,), jnp.float32) * 0.05

    return {
        "q_w": w(ks[0], H, H), "q_b": b(ks[1], H),
        "k_w": w(ks[2], H, H), "k_b": b(ks[3], H),
        "v_w": w(ks[4], H, H), "v_b": b(ks[5], H),
        "ao_w": w(ks[6], H, H), "ao_b": b(ks[7], H),
        "ao_ln_g": jnp.ones((H,), jnp.float32),
        "ao_ln_b": jnp.zeros((H,), jnp.float32),
        "i_w": w(ks[8], H, I), "i_b": b(ks[9], I),
        "o_w": w(ks[10], I, H), "o_b": b(ks[11], H),
        "o_ln_g": jnp.ones((H,), jnp.float32),
        "o_ln_b": jnp.zeros((H,), jnp.float32),
    }


# ---------------------------------------------------------------------------
# pure-JAX reference (mirrors the PyTorch forward, eval mode)
# ---------------------------------------------------------------------------
def _reference_forward(hidden, attention_mask, params, *, num_heads, eps=1e-12):
    def ln(x, g, b):
        u = x.mean(-1, keepdims=True)
        var = ((x - u) ** 2).mean(-1, keepdims=True)
        return g * (x - u) / jnp.sqrt(var + eps) + b

    B, S, H = hidden.shape
    dh = H // num_heads
    h = hidden
    for p in params:
        def heads(x):
            return x.reshape(B, S, num_heads, dh).transpose(0, 2, 1, 3)
        q = heads(h @ p["q_w"] + p["q_b"])
        k = heads(h @ p["k_w"] + p["k_b"])
        v = heads(h @ p["v_w"] + p["v_b"])
        s = jnp.einsum("bhqd,bhkd->bhqk", q, k) / math.sqrt(dh) + attention_mask
        a = jax.nn.softmax(s, axis=-1)
        ctx = jnp.einsum("bhqk,bhkd->bhqd", a, v).transpose(0, 2, 1, 3).reshape(B, S, H)
        attn_out = ln(ctx @ p["ao_w"] + p["ao_b"] + h, p["ao_ln_g"], p["ao_ln_b"])
        inter = jax.nn.relu(attn_out @ p["i_w"] + p["i_b"])
        h = ln(inter @ p["o_w"] + p["o_b"] + attn_out, p["o_ln_g"], p["o_ln_b"])
    return h


if __name__ == "__main__":
    # Small shapes consistent with the module:
    # batch=2, seq=8, hidden=32, intermediate=64, 4 heads, 2 layers
    B, S, H, I, NH, NL = 2, 8, 32, 64, 4, 2

    key = jax.random.PRNGKey(0)
    keys = jax.random.split(key, 1 + NL)
    hidden = jax.random.normal(keys[0], (B, S, H), dtype=jnp.float32)

    # BERT-style additive attention mask (B, 1, 1, S): 0 = keep, -10000 = mask.
    key_keep = jnp.ones((B, S), jnp.float32).at[1, -2:].set(0.0)
    attn_mask = (1.0 - key_keep)[:, None, None, :] * -10000.0

    raw_params = [init_layer_params(k, H, I) for k in keys[1:]]
    ref = _reference_forward(hidden, attn_mask, raw_params, num_heads=NH)

    # --- f32 path: tight numerical check against the pure-JAX reference ---
    params_f32 = prepare_params(raw_params, H, I, jnp.float32)
    fwd_f32 = jax.jit(functools.partial(mol_trans_encoder_forward,
                                        num_heads=NH, compute_dtype=jnp.float32))
    out_f32 = jax.block_until_ready(fwd_f32(hidden, attn_mask, params_f32))
    assert out_f32.shape == (B, S, H)
    err32 = float(jnp.max(jnp.abs(out_f32 - ref)))
    assert jnp.allclose(out_f32, ref, atol=2e-4, rtol=2e-4), f"f32 max_err={err32}"

    # --- bf16 MXU path (production config): loose sanity check ---
    params_bf16 = prepare_params(raw_params, H, I, jnp.bfloat16)
    fwd_bf16 = jax.jit(functools.partial(mol_trans_encoder_forward,
                                         num_heads=NH, compute_dtype=jnp.bfloat16))
    out_bf16 = jax.block_until_ready(fwd_bf16(hidden, attn_mask, params_bf16))
    assert out_bf16.shape == (B, S, H)
    assert bool(jnp.all(jnp.isfinite(out_bf16)))
    err16 = float(jnp.max(jnp.abs(out_bf16 - ref)))
    assert err16 < 0.3, f"bf16 max_err={err16}"

    print("KERNEL_OK")
</pallas_src>

<mosaic_0001>
module attributes {stable_mosaic.version = 11 : i64} {
  func.func @_attention_kernel(%arg0: i32, %arg1: memref<1x8x128xf32, #tpu.memory_space<vmem>>, %arg2: memref<1x8x128xf32, #tpu.memory_space<vmem>>, %arg3: memref<1x8x128xf32, #tpu.memory_space<vmem>>, %arg4: memref<1x1x8xf32, #tpu.memory_space<vmem>>, %arg5: memref<1x8x128xf32, #tpu.memory_space<vmem>>) attributes {dimension_semantics = [#tpu.dimension_semantics<parallel>], iteration_bounds = array<i64: 2>, scalar_prefetch = 0 : i64, scratch_operands = 0 : i64, tpu.core_type = #tpu.core_type<tc>, window_params = [{transform_indices = @transform_0, window_bounds = array<i64: 1, 8, 128>}, {transform_indices = @transform_1, window_bounds = array<i64: 1, 8, 128>}, {transform_indices = @transform_2, window_bounds = array<i64: 1, 8, 128>}, {transform_indices = @transform_3, window_bounds = array<i64: 1, 1, 8>}, {transform_indices = @transform_4, window_bounds = array<i64: 1, 8, 128>}]} {
    %c0 = arith.constant 0 : index
    %c0_0 = arith.constant 0 : index
    %c0_1 = arith.constant 0 : index
    %0 = vector.load %arg1[%c0, %c0_0, %c0_1] : memref<1x8x128xf32, #tpu.memory_space<vmem>>, vector<1x8x128xf32>
    %1 = vector.shape_cast %0 : vector<1x8x128xf32> to vector<8x128xf32>
    %c0_2 = arith.constant 0 : index
    %c0_3 = arith.constant 0 : index
    %c0_4 = arith.constant 0 : index
    %2 = vector.load %arg2[%c0_2, %c0_3, %c0_4] : memref<1x8x128xf32, #tpu.memory_space<vmem>>, vector<1x8x128xf32>
    %3 = vector.shape_cast %2 : vector<1x8x128xf32> to vector<8x128xf32>
    %c0_5 = arith.constant 0 : index
    %c0_6 = arith.constant 0 : index
    %c0_7 = arith.constant 0 : index
    %4 = vector.load %arg3[%c0_5, %c0_6, %c0_7] : memref<1x8x128xf32, #tpu.memory_space<vmem>>, vector<1x8x128xf32>
    %5 = vector.shape_cast %4 : vector<1x8x128xf32> to vector<8x128xf32>
    %c0_8 = arith.constant 0 : index
    %c0_9 = arith.constant 0 : index
    %c0_10 = arith.constant 0 : index
    %6 = vector.load %arg4[%c0_8, %c0_9, %c0_10] : memref<1x1x8xf32, #tpu.memory_space<vmem>>, vector<1x1x8xf32>
    %7 = vector.shape_cast %6 : vector<1x1x8xf32> to vector<1x8xf32>
    %8 = vector.extract_strided_slice %1 {offsets = [0, 0], sizes = [8, 8], strides = [1, 1]} : vector<8x128xf32> to vector<8x8xf32>
    %9 = vector.extract_strided_slice %3 {offsets = [0, 0], sizes = [8, 8], strides = [1, 1]} : vector<8x128xf32> to vector<8x8xf32>
    %10 = vector.extract_strided_slice %5 {offsets = [0, 0], sizes = [8, 8], strides = [1, 1]} : vector<8x128xf32> to vector<8x8xf32>
    %cst = arith.constant dense<0.000000e+00> : vector<8x8xf32>
    %11 = tpu.matmul %8, %9, %cst {dimension_numbers = #tpu.dot_dimension_numbers<[1], [1], [0], [0], [0, 0, 1, 0], [], []>} : vector<8x8xf32>, vector<8x8xf32>, vector<8x8xf32> -> vector<8x8xf32>
    %cst_11 = arith.constant 0.353553385 : f32
    %12 = vector.broadcast %cst_11 : f32 to vector<8x8xf32>
    %13 = arith.mulf %11, %12 : vector<8x8xf32>
    %14 = vector.broadcast %7 : vector<1x8xf32> to vector<8x8xf32>
    %15 = arith.addf %13, %14 : vector<8x8xf32>
    %cst_12 = arith.constant dense<0xFF800000> : vector<8xf32>
    %16 = vector.multi_reduction <maximumf>, %15, %cst_12 [1] : vector<8x8xf32> to vector<8xf32>
    %17 = vector.shape_cast %16 : vector<8xf32> to vector<8x1xf32>
    %18 = vector.broadcast %17 : vector<8x1xf32> to vector<8x8xf32>
    %19 = arith.subf %15, %18 : vector<8x8xf32>
    %20 = math.exp %19 : vector<8x8xf32>
    %cst_13 = arith.constant dense<0.000000e+00> : vector<8xf32>
    %21 = vector.multi_reduction <add>, %20, %cst_13 [1] : vector<8x8xf32> to vector<8xf32>
    %22 = vector.shape_cast %21 : vector<8xf32> to vector<8x1xf32>
    %23 = tpu.reciprocal %22 : vector<8x1xf32> -> vector<8x1xf32>
    %24 = vector.broadcast %23 : vector<8x1xf32> to vector<8x8xf32>
    %25 = arith.mulf %20, %24 : vector<8x8xf32>
    %cst_14 = arith.constant dense<0.000000e+00> : vector<8x8xf32>
    %26 = tpu.matmul %25, %10, %cst_14 {dimension_numbers = #tpu.dot_dimension_numbers<[1], [0], [0], [1], [0, 0, 1, 1], [], []>} : vector<8x8xf32>, vector<8x8xf32>, vector<8x8xf32> -> vector<8x8xf32>
    %27 = vector.extract_strided_slice %1 {offsets = [0, 8], sizes = [8, 8], strides = [1, 1]} : vector<8x128xf32> to vector<8x8xf32>
    %28 = vector.extract_strided_slice %3 {offsets = [0, 8], sizes = [8, 8], strides = [1, 1]} : vector<8x128xf32> to vector<8x8xf32>
    %29 = vector.extract_strided_slice %5 {offsets = [0, 8], sizes = [8, 8], strides = [1, 1]} : vector<8x128xf32> to vector<8x8xf32>
    %cst_15 = arith.constant dense<0.000000e+00> : vector<8x8xf32>
    %30 = tpu.matmul %27, %28, %cst_15 {dimension_numbers = #tpu.dot_dimension_numbers<[1], [1], [0], [0], [0, 0, 1, 0], [], []>} : vector<8x8xf32>, vector<8x8xf32>, vector<8x8xf32> -> vector<8x8xf32>
    %cst_16 = arith.constant 0.353553385 : f32
    %31 = vector.broadcast %cst_16 : f32 to vector<8x8xf32>
    %32 = arith.mulf %30, %31 : vector<8x8xf32>
    %33 = vector.broadcast %7 : vector<1x8xf32> to vector<8x8xf32>
    %34 = arith.addf %32, %33 : vector<8x8xf32>
    %cst_17 = arith.constant dense<0xFF800000> : vector<8xf32>
    %35 = vector.multi_reduction <maximumf>, %34, %cst_17 [1] : vector<8x8xf32> to vector<8xf32>
    %36 = vector.shape_cast %35 : vector<8xf32> to vector<8x1xf32>
    %37 = vector.broadcast %36 : vector<8x1xf32> to vector<8x8xf32>
    %38 = arith.subf %34, %37 : vector<8x8xf32>
    %39 = math.exp %38 : vector<8x8xf32>
    %cst_18 = arith.constant dense<0.000000e+00> : vector<8xf32>
    %40 = vector.multi_reduction <add>, %39, %cst_18 [1] : vector<8x8xf32> to vector<8xf32>
    %41 = vector.shape_cast %40 : vector<8xf32> to vector<8x1xf32>
    %42 = tpu.reciprocal %41 : vector<8x1xf32> -> vector<8x1xf32>
    %43 = vector.broadcast %42 : vector<8x1xf32> to vector<8x8xf32>
    %44 = arith.mulf %39, %43 : vector<8x8xf32>
    %cst_19 = arith.constant dense<0.000000e+00> : vector<8x8xf32>
    %45 = tpu.matmul %44, %29, %cst_19 {dimension_numbers = #tpu.dot_dimension_numbers<[1], [0], [0], [1], [0, 0, 1, 1], [], []>} : vector<8x8xf32>, vector<8x8xf32>, vector<8x8xf32> -> vector<8x8xf32>
    %46 = vector.extract_strided_slice %1 {offsets = [0, 16], sizes = [8, 8], strides = [1, 1]} : vector<8x128xf32> to vector<8x8xf32>
    %47 = vector.extract_strided_slice %3 {offsets = [0, 16], sizes = [8, 8], strides = [1, 1]} : vector<8x128xf32> to vector<8x8xf32>
    %48 = vector.extract_strided_slice %5 {offsets = [0, 16], sizes = [8, 8], strides = [1, 1]} : vector<8x128xf32> to vector<8x8xf32>
    %cst_20 = arith.constant dense<0.000000e+00> : vector<8x8xf32>
    %49 = tpu.matmul %46, %47, %cst_20 {dimension_numbers = #tpu.dot_dimension_numbers<[1], [1], [0], [0], [0, 0, 1, 0], [], []>} : vector<8x8xf32>, vector<8x8xf32>, vector<8x8xf32> -> vector<8x8xf32>
    %cst_21 = arith.constant 0.353553385 : f32
    %50 = vector.broadcast %cst_21 : f32 to vector<8x8xf32>
    %51 = arith.mulf %49, %50 : vector<8x8xf32>
    %52 = vector.broadcast %7 : vector<1x8xf32> to vector<8x8xf32>
    %53 = arith.addf %51, %52 : vector<8x8xf32>
    %cst_22 = arith.constant dense<0xFF800000> : vector<8xf32>
    %54 = vector.multi_reduction <maximumf>, %53, %cst_22 [1] : vector<8x8xf32> to vector<8xf32>
    %55 = vector.shape_cast %54 : vector<8xf32> to vector<8x1xf32>
    %56 = vector.broadcast %55 : vector<8x1xf32> to vector<8x8xf32>
    %57 = arith.subf %53, %56 : vector<8x8xf32>
    %58 = math.exp %57 : vector<8x8xf32>
    %cst_23 = arith.constant dense<0.000000e+00> : vector<8xf32>
    %59 = vector.multi_reduction <add>, %58, %cst_23 [1] : vector<8x8xf32> to vector<8xf32>
    %60 = vector.shape_cast %59 : vector<8xf32> to vector<8x1xf32>
    %61 = tpu.reciprocal %60 : vector<8x1xf32> -> vector<8x1xf32>
    %62 = vector.broadcast %61 : vector<8x1xf32> to vector<8x8xf32>
    %63 = arith.mulf %58, %62 : vector<8x8xf32>
    %cst_24 = arith.constant dense<0.000000e+00> : vector<8x8xf32>
    %64 = tpu.matmul %63, %48, %cst_24 {dimension_numbers = #tpu.dot_dimension_numbers<[1], [0], [0], [1], [0, 0, 1, 1], [], []>} : vector<8x8xf32>, vector<8x8xf32>, vector<8x8xf32> -> vector<8x8xf32>
    %65 = vector.extract_strided_slice %1 {offsets = [0, 24], sizes = [8, 8], strides = [1, 1]} : vector<8x128xf32> to vector<8x8xf32>
    %66 = vector.extract_strided_slice %3 {offsets = [0, 24], sizes = [8, 8], strides = [1, 1]} : vector<8x128xf32> to vector<8x8xf32>
    %67 = vector.extract_strided_slice %5 {offsets = [0, 24], sizes = [8, 8], strides = [1, 1]} : vector<8x128xf32> to vector<8x8xf32>
    %cst_25 = arith.constant dense<0.000000e+00> : vector<8x8xf32>
    %68 = tpu.matmul %65, %66, %cst_25 {dimension_numbers = #tpu.dot_dimension_numbers<[1], [1], [0], [0], [0, 0, 1, 0], [], []>} : vector<8x8xf32>, vector<8x8xf32>, vector<8x8xf32> -> vector<8x8xf32>
    %cst_26 = arith.constant 0.353553385 : f32
    %69 = vector.broadcast %cst_26 : f32 to vector<8x8xf32>
    %70 = arith.mulf %68, %69 : vector<8x8xf32>
    %71 = vector.broadcast %7 : vector<1x8xf32> to vector<8x8xf32>
    %72 = arith.addf %70, %71 : vector<8x8xf32>
    %cst_27 = arith.constant dense<0xFF800000> : vector<8xf32>
    %73 = vector.multi_reduction <maximumf>, %72, %cst_27 [1] : vector<8x8xf32> to vector<8xf32>
    %74 = vector.shape_cast %73 : vector<8xf32> to vector<8x1xf32>
    %75 = vector.broadcast %74 : vector<8x1xf32> to vector<8x8xf32>
    %76 = arith.subf %72, %75 : vector<8x8xf32>
    %77 = math.exp %76 : vector<8x8xf32>
    %cst_28 = arith.constant dense<0.000000e+00> : vector<8xf32>
    %78 = vector.multi_reduction <add>, %77, %cst_28 [1] : vector<8x8xf32> to vector<8xf32>
    %79 = vector.shape_cast %78 : vector<8xf32> to vector<8x1xf32>
    %80 = tpu.reciprocal %79 : vector<8x1xf32> -> vector<8x1xf32>
    %81 = vector.broadcast %80 : vector<8x1xf32> to vector<8x8xf32>
    %82 = arith.mulf %77, %81 : vector<8x8xf32>
    %cst_29 = arith.constant dense<0.000000e+00> : vector<8x8xf32>
    %83 = tpu.matmul %82, %67, %cst_29 {dimension_numbers = #tpu.dot_dimension_numbers<[1], [0], [0], [1], [0, 0, 1, 1], [], []>} : vector<8x8xf32>, vector<8x8xf32>, vector<8x8xf32> -> vector<8x8xf32>
    %cst_30 = arith.constant 0.000000e+00 : f32
    %84 = vector.broadcast %cst_30 : f32 to vector<8x96xf32>
    %85 = tpu.concatenate %26, %45, %64, %83, %84 in 1 : vector<8x8xf32>, vector<8x8xf32>, vector<8x8xf32>, vector<8x8xf32>, vector<8x96xf32> -> vector<8x128xf32>
    %c0_31 = arith.constant 0 : index
    %c0_32 = arith.constant 0 : index
    %c0_33 = arith.constant 0 : index
    %86 = vector.load %arg5[%c0_31, %c0_32, %c0_33] : memref<1x8x128xf32, #tpu.memory_space<vmem>>, vector<1x8x128xf32>
    %87 = vector.shape_cast %86 : vector<1x8x128xf32> to vector<8x128xf32>
    %88 = vector.shape_cast %85 : vector<8x128xf32> to vector<1x8x128xf32>
    tpu.vector_store %arg5[%c0_31, %c0_32, %c0_33], %88 {strides = array<i32>} : memref<1x8x128xf32, #tpu.memory_space<vmem>>, vector<1x8x128xf32>,
    return
  }
  func.func @transform_0(%arg0: i32) -> (i32, i32, i32) {
    %c0_i32 = arith.constant 0 : i32
    %c0_i32_0 = arith.constant 0 : i32
    %c0_i32_1 = arith.constant 0 : i32
    return %arg0, %c0_i32, %c0_i32_0 : i32, i32, i32
  }
  func.func @transform_1(%arg0: i32) -> (i32, i32, i32) {
    %c0_i32 = arith.constant 0 : i32
    %c0_i32_0 = arith.constant 0 : i32
    %c0_i32_1 = arith.constant 0 : i32
    return %arg0, %c0_i32, %c0_i32_0 : i32, i32, i32
  }
  func.func @transform_2(%arg0: i32) -> (i32, i32, i32) {
    %c0_i32 = arith.constant 0 : i32
    %c0_i32_0 = arith.constant 0 : i32
    %c0_i32_1 = arith.constant 0 : i32
    return %arg0, %c0_i32, %c0_i32_0 : i32, i32, i32
  }
  func.func @transform_3(%arg0: i32) -> (i32, i32, i32) {
    %c0_i32 = arith.constant 0 : i32
    %c0_i32_0 = arith.constant 0 : i32
    %c0_i32_1 = arith.constant 0 : i32
    return %arg0, %c0_i32, %c0_i32_0 : i32, i32, i32
  }
  func.func @transform_4(%arg0: i32) -> (i32, i32, i32) {
    %c0_i32 = arith.constant 0 : i32
    %c0_i32_0 = arith.constant 0 : i32
    %c0_i32_1 = arith.constant 0 : i32
    return %arg0, %c0_i32, %c0_i32_0 : i32, i32, i32
  }
}

module attributes {stable_mosaic.version = 11 : i64} {
  func.func @_qkv_dense_kernel(%arg0: i32, %arg1: memref<8x128xf32, #tpu.memory_space<vmem>>, %arg2: memref<3x128x128xf32, #tpu.memory_space<vmem>>, %arg3: memref<3x1x128xf32, #tpu.memory_space<vmem>>, %arg4: memref<3x8x128xf32, #tpu.memory_space<vmem>>) attributes {dimension_semantics = [#tpu.dimension_semantics<parallel>], iteration_bounds = array<i64: 2>, scalar_prefetch = 0 : i64, scratch_operands = 0 : i64, tpu.core_type = #tpu.core_type<tc>, window_params = [{transform_indices = @transform_0, window_bounds = array<i64: 8, 128>}, {pipeline_mode = #tpu.pipeline_mode<synchronous>, transform_indices = @transform_1, window_bounds = array<i64: 3, 128, 128>}, {pipeline_mode = #tpu.pipeline_mode<synchronous>, transform_indices = @transform_2, window_bounds = array<i64: 3, 1, 128>}, {transform_indices = @transform_3, window_bounds = array<i64: 3, 8, 128>}]} {
    %c0 = arith.constant 0 : index
    %c0_0 = arith.constant 0 : index
    %0 = vector.load %arg1[%c0, %c0_0] : memref<8x128xf32, #tpu.memory_space<vmem>>, vector<8x128xf32>
    %c0_1 = arith.constant 0 : index
    %c0_2 = arith.constant 0 : index
    %c0_3 = arith.constant 0 : index
    %1 = vector.load %arg2[%c0_1, %c0_2, %c0_3] : memref<3x128x128xf32, #tpu.memory_space<vmem>>, vector<1x128x128xf32>
    %2 = vector.shape_cast %1 : vector<1x128x128xf32> to vector<128x128xf32>
    %cst = arith.constant dense<0.000000e+00> : vector<8x128xf32>
    %3 = tpu.matmul %0, %2, %cst {dimension_numbers = #tpu.dot_dimension_numbers<[1], [0], [0], [1], [0, 0, 1, 1], [], []>} : vector<8x128xf32>, vector<128x128xf32>, vector<8x128xf32> -> vector<8x128xf32>
    %c0_4 = arith.constant 0 : index
    %c0_5 = arith.constant 0 : index
    %c0_6 = arith.constant 0 : index
    %4 = vector.load %arg3[%c0_4, %c0_5, %c0_6] : memref<3x1x128xf32, #tpu.memory_space<vmem>>, vector<1x1x128xf32>
    %5 = vector.shape_cast %4 : vector<1x1x128xf32> to vector<1x128xf32>
    %6 = vector.broadcast %5 : vector<1x128xf32> to vector<8x128xf32>
    %7 = arith.addf %3, %6 : vector<8x128xf32>
    %c0_7 = arith.constant 0 : index
    %c0_8 = arith.constant 0 : index
    %c0_9 = arith.constant 0 : index
    %8 = vector.load %arg4[%c0_7, %c0_8, %c0_9] : memref<3x8x128xf32, #tpu.memory_space<vmem>>, vector<1x8x128xf32>
    %9 = vector.shape_cast %8 : vector<1x8x128xf32> to vector<8x128xf32>
    %10 = vector.shape_cast %7 : vector<8x128xf32> to vector<1x8x128xf32>
    tpu.vector_store %arg4[%c0_7, %c0_8, %c0_9], %10 {strides = array<i32>} : memref<3x8x128xf32, #tpu.memory_space<vmem>>, vector<1x8x128xf32>,
    %c1 = arith.constant 1 : index
    %c0_10 = arith.constant 0 : index
    %c0_11 = arith.constant 0 : index
    %11 = vector.load %arg2[%c1, %c0_10, %c0_11] : memref<3x128x128xf32, #tpu.memory_space<vmem>>, vector<1x128x128xf32>
    %12 = vector.shape_cast %11 : vector<1x128x128xf32> to vector<128x128xf32>
    %cst_12 = arith.constant dense<0.000000e+00> : vector<8x128xf32>
    %13 = tpu.matmul %0, %12, %cst_12 {dimension_numbers = #tpu.dot_dimension_numbers<[1], [0], [0], [1], [0, 0, 1, 1], [], []>} : vector<8x128xf32>, vector<128x128xf32>, vector<8x128xf32> -> vector<8x128xf32>
    %c1_13 = arith.constant 1 : index
    %c0_14 = arith.constant 0 : index
    %c0_15 = arith.constant 0 : index
    %14 = vector.load %arg3[%c1_13, %c0_14, %c0_15] : memref<3x1x128xf32, #tpu.memory_space<vmem>>, vector<1x1x128xf32>
    %15 = vector.shape_cast %14 : vector<1x1x128xf32> to vector<1x128xf32>
    %16 = vector.broadcast %15 : vector<1x128xf32> to vector<8x128xf32>
    %17 = arith.addf %13, %16 : vector<8x128xf32>
    %c1_16 = arith.constant 1 : index
    %c0_17 = arith.constant 0 : index
    %c0_18 = arith.constant 0 : index
    %18 = vector.load %arg4[%c1_16, %c0_17, %c0_18] : memref<3x8x128xf32, #tpu.memory_space<vmem>>, vector<1x8x128xf32>
    %19 = vector.shape_cast %18 : vector<1x8x128xf32> to vector<8x128xf32>
    %20 = vector.shape_cast %17 : vector<8x128xf32> to vector<1x8x128xf32>
    tpu.vector_store %arg4[%c1_16, %c0_17, %c0_18], %20 {strides = array<i32>} : memref<3x8x128xf32, #tpu.memory_space<vmem>>, vector<1x8x128xf32>,
    %c2 = arith.constant 2 : index
    %c0_19 = arith.constant 0 : index
    %c0_20 = arith.constant 0 : index
    %21 = vector.load %arg2[%c2, %c0_19, %c0_20] : memref<3x128x128xf32, #tpu.memory_space<vmem>>, vector<1x128x128xf32>
    %22 = vector.shape_cast %21 : vector<1x128x128xf32> to vector<128x128xf32>
    %cst_21 = arith.constant dense<0.000000e+00> : vector<8x128xf32>
    %23 = tpu.matmul %0, %22, %cst_21 {dimension_numbers = #tpu.dot_dimension_numbers<[1], [0], [0], [1], [0, 0, 1, 1], [], []>} : vector<8x128xf32>, vector<128x128xf32>, vector<8x128xf32> -> vector<8x128xf32>
    %c2_22 = arith.constant 2 : index
    %c0_23 = arith.constant 0 : index
    %c0_24 = arith.constant 0 : index
    %24 = vector.load %arg3[%c2_22, %c0_23, %c0_24] : memref<3x1x128xf32, #tpu.memory_space<vmem>>, vector<1x1x128xf32>
    %25 = vector.shape_cast %24 : vector<1x1x128xf32> to vector<1x128xf32>
    %26 = vector.broadcast %25 : vector<1x128xf32> to vector<8x128xf32>
    %27 = arith.addf %23, %26 : vector<8x128xf32>
    %c2_25 = arith.constant 2 : index
    %c0_26 = arith.constant 0 : index
    %c0_27 = arith.constant 0 : index
    %28 = vector.load %arg4[%c2_25, %c0_26, %c0_27] : memref<3x8x128xf32, #tpu.memory_space<vmem>>, vector<1x8x128xf32>
    %29 = vector.shape_cast %28 : vector<1x8x128xf32> to vector<8x128xf32>
    %30 = vector.shape_cast %27 : vector<8x128xf32> to vector<1x8x128xf32>
    tpu.vector_store %arg4[%c2_25, %c0_26, %c0_27], %30 {strides = array<i32>} : memref<3x8x128xf32, #tpu.memory_space<vmem>>, vector<1x8x128xf32>,
    return
  }
  func.func @transform_0(%arg0: i32) -> (i32, i32) {
    %c0_i32 = arith.constant 0 : i32
    %c0_i32_0 = arith.constant 0 : i32
    return %arg0, %c0_i32 : i32, i32
  }
  func.func @transform_1(%arg0: i32) -> (i32, i32, i32) {
    %c0_i32 = arith.constant 0 : i32
    %c0_i32_0 = arith.constant 0 : i32
    %c0_i32_1 = arith.constant 0 : i32
    %c0_i32_2 = arith.constant 0 : i32
    return %c0_i32, %c0_i32_0, %c0_i32_1 : i32, i32, i32
  }
  func.func @transform_2(%arg0: i32) -> (i32, i32, i32) {
    %c0_i32 = arith.constant 0 : i32
    %c0_i32_0 = arith.constant 0 : i32
    %c0_i32_1 = arith.constant 0 : i32
    %c0_i32_2 = arith.constant 0 : i32
    return %c0_i32, %c0_i32_0, %c0_i32_1 : i32, i32, i32
  }
  func.func @transform_3(%arg0: i32) -> (i32, i32, i32) {
    %c0_i32 = arith.constant 0 : i32
    %c0_i32_0 = arith.constant 0 : i32
    %c0_i32_1 = arith.constant 0 : i32
    return %c0_i32, %arg0, %c0_i32_0 : i32, i32, i32
  }
}

module attributes {stable_mosaic.version = 11 : i64} {
  func.func @_dense_res_ln_kernel(%arg0: i32, %arg1: memref<8x128xf32, #tpu.memory_space<vmem>>, %arg2: memref<128x128xf32, #tpu.memory_space<vmem>>, %arg3: memref<1x128xf32, #tpu.memory_space<vmem>>, %arg4: memref<8x128xf32, #tpu.memory_space<vmem>>, %arg5: memref<1x128xf32, #tpu.memory_space<vmem>>, %arg6: memref<1x128xf32, #tpu.memory_space<vmem>>, %arg7: memref<8x128xf32, #tpu.memory_space<vmem>>) attributes {dimension_semantics = [#tpu.dimension_semantics<parallel>], iteration_bounds = array<i64: 2>, scalar_prefetch = 0 : i64, scratch_operands = 0 : i64, tpu.core_type = #tpu.core_type<tc>, window_params = [{transform_indices = @transform_0, window_bounds = array<i64: 8, 128>}, {pipeline_mode = #tpu.pipeline_mode<synchronous>, transform_indices = @transform_1, window_bounds = array<i64: 128, 128>}, {pipeline_mode = #tpu.pipeline_mode<synchronous>, transform_indices = @transform_2, window_bounds = array<i64: 1, 128>}, {transform_indices = @transform_3, window_bounds = array<i64: 8, 128>}, {pipeline_mode = #tpu.pipeline_mode<synchronous>, transform_indices = @transform_4, window_bounds = array<i64: 1, 128>}, {pipeline_mode = #tpu.pipeline_mode<synchronous>, transform_indices = @transform_5, window_bounds = array<i64: 1, 128>}, {transform_indices = @transform_6, window_bounds = array<i64: 8, 128>}]} {
    %c0 = arith.constant 0 : index
    %c0_0 = arith.constant 0 : index
    %0 = vector.load %arg1[%c0, %c0_0] : memref<8x128xf32, #tpu.memory_space<vmem>>, vector<8x128xf32>
    %c0_1 = arith.constant 0 : index
    %c0_2 = arith.constant 0 : index
    %1 = vector.load %arg2[%c0_1, %c0_2] : memref<128x128xf32, #tpu.memory_space<vmem>>, vector<128x128xf32>
    %cst = arith.constant dense<0.000000e+00> : vector<8x128xf32>
    %2 = tpu.matmul %0, %1, %cst {dimension_numbers = #tpu.dot_dimension_numbers<[1], [0], [0], [1], [0, 0, 1, 1], [], []>} : vector<8x128xf32>, vector<128x128xf32>, vector<8x128xf32> -> vector<8x128xf32>
    %c0_3 = arith.constant 0 : index
    %c0_4 = arith.constant 0 : index
    %3 = vector.load %arg3[%c0_3, %c0_4] : memref<1x128xf32, #tpu.memory_space<vmem>>, vector<1x128xf32>
    %4 = vector.broadcast %3 : vector<1x128xf32> to vector<8x128xf32>
    %5 = arith.addf %2, %4 : vector<8x128xf32>
    %c0_5 = arith.constant 0 : index
    %c0_6 = arith.constant 0 : index
    %6 = vector.load %arg4[%c0_5, %c0_6] : memref<8x128xf32, #tpu.memory_space<vmem>>, vector<8x128xf32>
    %7 = arith.addf %5, %6 : vector<8x128xf32>
    %8 = tpu.iota {dimensions = array<i32: 1>} : vector<8x128xi32>
    %c32_i32 = arith.constant 32 : i32
    %9 = vector.broadcast %c32_i32 : i32 to vector<8x128xi32>
    %10 = arith.cmpi slt, %8, %9 : vector<8x128xi32>
    %cst_7 = arith.constant 0.000000e+00 : f32
    %11 = vector.broadcast %cst_7 : f32 to vector<8x128xf32>
    %12 = arith.select %10, %7, %11 : vector<8x128xi1>, vector<8x128xf32>
    %cst_8 = arith.constant dense<0.000000e+00> : vector<8xf32>
    %13 = vector.multi_reduction <add>, %12, %cst_8 [1] : vector<8x128xf32> to vector<8xf32>
    %14 = vector.shape_cast %13 : vector<8xf32> to vector<8x1xf32>
    %cst_9 = arith.constant 3.125000e-02 : f32
    %15 = vector.broadcast %cst_9 : f32 to vector<8x1xf32>
    %16 = arith.mulf %14, %15 : vector<8x1xf32>
    %17 = vector.broadcast %16 : vector<8x1xf32> to vector<8x128xf32>
    %18 = arith.subf %12, %17 : vector<8x128xf32>
    %cst_10 = arith.constant 0.000000e+00 : f32
    %19 = vector.broadcast %cst_10 : f32 to vector<8x128xf32>
    %20 = arith.select %10, %18, %19 : vector<8x128xi1>, vector<8x128xf32>
    %21 = arith.mulf %20, %20 : vector<8x128xf32>
    %cst_11 = arith.constant dense<0.000000e+00> : vector<8xf32>
    %22 = vector.multi_reduction <add>, %21, %cst_11 [1] : vector<8x128xf32> to vector<8xf32>
    %23 = vector.shape_cast %22 : vector<8xf32> to vector<8x1xf32>
    %cst_12 = arith.constant 3.125000e-02 : f32
    %24 = vector.broadcast %cst_12 : f32 to vector<8x1xf32>
    %25 = arith.mulf %23, %24 : vector<8x1xf32>
    %cst_13 = arith.constant 9.99999996E-13 : f32
    %26 = vector.broadcast %cst_13 : f32 to vector<8x1xf32>
    %27 = arith.addf %25, %26 : vector<8x1xf32>
    %28 = math.rsqrt %27 : vector<8x1xf32>
    %29 = vector.broadcast %28 : vector<8x1xf32> to vector<8x128xf32>
    %30 = arith.mulf %20, %29 : vector<8x128xf32>
    %c0_14 = arith.constant 0 : index
    %c0_15 = arith.constant 0 : index
    %31 = vector.load %arg5[%c0_14, %c0_15] : memref<1x128xf32, #tpu.memory_space<vmem>>, vector<1x128xf32>
    %32 = vector.broadcast %31 : vector<1x128xf32> to vector<8x128xf32>
    %33 = arith.mulf %30, %32 : vector<8x128xf32>
    %c0_16 = arith.constant 0 : index
    %c0_17 = arith.constant 0 : index
    %34 = vector.load %arg6[%c0_16, %c0_17] : memref<1x128xf32, #tpu.memory_space<vmem>>, vector<1x128xf32>
    %35 = vector.broadcast %34 : vector<1x128xf32> to vector<8x128xf32>
    %36 = arith.addf %33, %35 : vector<8x128xf32>
    %c0_18 = arith.constant 0 : index
    %c0_19 = arith.constant 0 : index
    %37 = vector.load %arg7[%c0_18, %c0_19] : memref<8x128xf32, #tpu.memory_space<vmem>>, vector<8x128xf32>
    tpu.vector_store %arg7[%c0_18, %c0_19], %36 {strides = array<i32>} : memref<8x128xf32, #tpu.memory_space<vmem>>, vector<8x128xf32>,
    return
  }
  func.func @transform_0(%arg0: i32) -> (i32, i32) {
    %c0_i32 = arith.constant 0 : i32
    %c0_i32_0 = arith.constant 0 : i32
    return %arg0, %c0_i32 : i32, i32
  }
  func.func @transform_1(%arg0: i32) -> (i32, i32) {
    %c0_i32 = arith.constant 0 : i32
    %c0_i32_0 = arith.constant 0 : i32
    %c0_i32_1 = arith.constant 0 : i32
    return %c0_i32, %c0_i32_0 : i32, i32
  }
  func.func @transform_2(%arg0: i32) -> (i32, i32) {
    %c0_i32 = arith.constant 0 : i32
    %c0_i32_0 = arith.constant 0 : i32
    %c0_i32_1 = arith.constant 0 : i32
    return %c0_i32, %c0_i32_0 : i32, i32
  }
  func.func @transform_3(%arg0: i32) -> (i32, i32) {
    %c0_i32 = arith.constant 0 : i32
    %c0_i32_0 = arith.constant 0 : i32
    return %arg0, %c0_i32 : i32, i32
  }
  func.func @transform_4(%arg0: i32) -> (i32, i32) {
    %c0_i32 = arith.constant 0 : i32
    %c0_i32_0 = arith.constant 0 : i32
    %c0_i32_1 = arith.constant 0 : i32
    return %c0_i32, %c0_i32_0 : i32, i32
  }
  func.func @transform_5(%arg0: i32) -> (i32, i32) {
    %c0_i32 = arith.constant 0 : i32
    %c0_i32_0 = arith.constant 0 : i32
    %c0_i32_1 = arith.constant 0 : i32
    return %c0_i32, %c0_i32_0 : i32, i32
  }
  func.func @transform_6(%arg0: i32) -> (i32, i32) {
    %c0_i32 = arith.constant 0 : i32
    %c0_i32_0 = arith.constant 0 : i32
    return %arg0, %c0_i32 : i32, i32
  }
}

module attributes {stable_mosaic.version = 11 : i64} {
  func.func @_dense_kernel(%arg0: i32, %arg1: memref<8x128xf32, #tpu.memory_space<vmem>>, %arg2: memref<128x128xf32, #tpu.memory_space<vmem>>, %arg3: memref<1x128xf32, #tpu.memory_space<vmem>>, %arg4: memref<8x128xf32, #tpu.memory_space<vmem>>) attributes {dimension_semantics = [#tpu.dimension_semantics<parallel>], iteration_bounds = array<i64: 2>, scalar_prefetch = 0 : i64, scratch_operands = 0 : i64, tpu.core_type = #tpu.core_type<tc>, window_params = [{transform_indices = @transform_0, window_bounds = array<i64: 8, 128>}, {pipeline_mode = #tpu.pipeline_mode<synchronous>, transform_indices = @transform_1, window_bounds = array<i64: 128, 128>}, {pipeline_mode = #tpu.pipeline_mode<synchronous>, transform_indices = @transform_2, window_bounds = array<i64: 1, 128>}, {transform_indices = @transform_3, window_bounds = array<i64: 8, 128>}]} {
    %c0 = arith.constant 0 : index
    %c0_0 = arith.constant 0 : index
    %0 = vector.load %arg1[%c0, %c0_0] : memref<8x128xf32, #tpu.memory_space<vmem>>, vector<8x128xf32>
    %c0_1 = arith.constant 0 : index
    %c0_2 = arith.constant 0 : index
    %1 = vector.load %arg2[%c0_1, %c0_2] : memref<128x128xf32, #tpu.memory_space<vmem>>, vector<128x128xf32>
    %cst = arith.constant dense<0.000000e+00> : vector<8x128xf32>
    %2 = tpu.matmul %0, %1, %cst {dimension_numbers = #tpu.dot_dimension_numbers<[1], [0], [0], [1], [0, 0, 1, 1], [], []>} : vector<8x128xf32>, vector<128x128xf32>, vector<8x128xf32> -> vector<8x128xf32>
    %c0_3 = arith.constant 0 : index
    %c0_4 = arith.constant 0 : index
    %3 = vector.load %arg3[%c0_3, %c0_4] : memref<1x128xf32, #tpu.memory_space<vmem>>, vector<1x128xf32>
    %4 = vector.broadcast %3 : vector<1x128xf32> to vector<8x128xf32>
    %5 = arith.addf %2, %4 : vector<8x128xf32>
    %cst_5 = arith.constant 0.000000e+00 : f32
    %6 = vector.broadcast %cst_5 : f32 to vector<8x128xf32>
    %7 = arith.maximumf %5, %6 : vector<8x128xf32>
    %c0_6 = arith.constant 0 : index
    %c0_7 = arith.constant 0 : index
    %8 = vector.load %arg4[%c0_6, %c0_7] : memref<8x128xf32, #tpu.memory_space<vmem>>, vector<8x128xf32>
    tpu.vector_store %arg4[%c0_6, %c0_7], %7 {strides = array<i32>} : memref<8x128xf32, #tpu.memory_space<vmem>>, vector<8x128xf32>,
    return
  }
  func.func @transform_0(%arg0: i32) -> (i32, i32) {
    %c0_i32 = arith.constant 0 : i32
    %c0_i32_0 = arith.constant 0 : i32
    return %arg0, %c0_i32 : i32, i32
  }
  func.func @transform_1(%arg0: i32) -> (i32, i32) {
    %c0_i32 = arith.constant 0 : i32
    %c0_i32_0 = arith.constant 0 : i32
    %c0_i32_1 = arith.constant 0 : i32
    return %c0_i32, %c0_i32_0 : i32, i32
  }
  func.func @transform_2(%arg0: i32) -> (i32, i32) {
    %c0_i32 = arith.constant 0 : i32
    %c0_i32_0 = arith.constant 0 : i32
    %c0_i32_1 = arith.constant 0 : i32
    return %c0_i32, %c0_i32_0 : i32, i32
  }
  func.func @transform_3(%arg0: i32) -> (i32, i32) {
    %c0_i32 = arith.constant 0 : i32
    %c0_i32_0 = arith.constant 0 : i32
    return %arg0, %c0_i32 : i32, i32
  }
}

module attributes {stable_mosaic.version = 11 : i64} {
  func.func @_dense_res_ln_kernel(%arg0: i32, %arg1: memref<8x128xf32, #tpu.memory_space<vmem>>, %arg2: memref<128x128xf32, #tpu.memory_space<vmem>>, %arg3: memref<1x128xf32, #tpu.memory_space<vmem>>, %arg4: memref<8x128xf32, #tpu.memory_space<vmem>>, %arg5: memref<1x128xf32, #tpu.memory_space<vmem>>, %arg6: memref<1x128xf32, #tpu.memory_space<vmem>>, %arg7: memref<8x128xf32, #tpu.memory_space<vmem>>) attributes {dimension_semantics = [#tpu.dimension_semantics<parallel>], iteration_bounds = array<i64: 2>, scalar_prefetch = 0 : i64, scratch_operands = 0 : i64, tpu.core_type = #tpu.core_type<tc>, window_params = [{transform_indices = @transform_0, window_bounds = array<i64: 8, 128>}, {pipeline_mode = #tpu.pipeline_mode<synchronous>, transform_indices = @transform_1, window_bounds = array<i64: 128, 128>}, {pipeline_mode = #tpu.pipeline_mode<synchronous>, transform_indices = @transform_2, window_bounds = array<i64: 1, 128>}, {transform_indices = @transform_3, window_bounds = array<i64: 8, 128>}, {pipeline_mode = #tpu.pipeline_mode<synchronous>, transform_indices = @transform_4, window_bounds = array<i64: 1, 128>}, {pipeline_mode = #tpu.pipeline_mode<synchronous>, transform_indices = @transform_5, window_bounds = array<i64: 1, 128>}, {transform_indices = @transform_6, window_bounds = array<i64: 8, 128>}]} {
    %c0 = arith.constant 0 : index
    %c0_0 = arith.constant 0 : index
    %0 = vector.load %arg1[%c0, %c0_0] : memref<8x128xf32, #tpu.memory_space<vmem>>, vector<8x128xf32>
    %c0_1 = arith.constant 0 : index
    %c0_2 = arith.constant 0 : index
    %1 = vector.load %arg2[%c0_1, %c0_2] : memref<128x128xf32, #tpu.memory_space<vmem>>, vector<128x128xf32>
    %cst = arith.constant dense<0.000000e+00> : vector<8x128xf32>
    %2 = tpu.matmul %0, %1, %cst {dimension_numbers = #tpu.dot_dimension_numbers<[1], [0], [0], [1], [0, 0, 1, 1], [], []>} : vector<8x128xf32>, vector<128x128xf32>, vector<8x128xf32> -> vector<8x128xf32>
    %c0_3 = arith.constant 0 : index
    %c0_4 = arith.constant 0 : index
    %3 = vector.load %arg3[%c0_3, %c0_4] : memref<1x128xf32, #tpu.memory_space<vmem>>, vector<1x128xf32>
    %4 = vector.broadcast %3 : vector<1x128xf32> to vector<8x128xf32>
    %5 = arith.addf %2, %4 : vector<8x128xf32>
    %c0_5 = arith.constant 0 : index
    %c0_6 = arith.constant 0 : index
    %6 = vector.load %arg4[%c0_5, %c0_6] : memref<8x128xf32, #tpu.memory_space<vmem>>, vector<8x128xf32>
    %7 = arith.addf %5, %6 : vector<8x128xf32>
    %8 = tpu.iota {dimensions = array<i32: 1>} : vector<8x128xi32>
    %c32_i32 = arith.constant 32 : i32
    %9 = vector.broadcast %c32_i32 : i32 to vector<8x128xi32>
    %10 = arith.cmpi slt, %8, %9 : vector<8x128xi32>
    %cst_7 = arith.constant 0.000000e+00 : f32
    %11 = vector.broadcast %cst_7 : f32 to vector<8x128xf32>
    %12 = arith.select %10, %7, %11 : vector<8x128xi1>, vector<8x128xf32>
    %cst_8 = arith.constant dense<0.000000e+00> : vector<8xf32>
    %13 = vector.multi_reduction <add>, %12, %cst_8 [1] : vector<8x128xf32> to vector<8xf32>
    %14 = vector.shape_cast %13 : vector<8xf32> to vector<8x1xf32>
    %cst_9 = arith.constant 3.125000e-02 : f32
    %15 = vector.broadcast %cst_9 : f32 to vector<8x1xf32>
    %16 = arith.mulf %14, %15 : vector<8x1xf32>
    %17 = vector.broadcast %16 : vector<8x1xf32> to vector<8x128xf32>
    %18 = arith.subf %12, %17 : vector<8x128xf32>
    %cst_10 = arith.constant 0.000000e+00 : f32
    %19 = vector.broadcast %cst_10 : f32 to vector<8x128xf32>
    %20 = arith.select %10, %18, %19 : vector<8x128xi1>, vector<8x128xf32>
    %21 = arith.mulf %20, %20 : vector<8x128xf32>
    %cst_11 = arith.constant dense<0.000000e+00> : vector<8xf32>
    %22 = vector.multi_reduction <add>, %21, %cst_11 [1] : vector<8x128xf32> to vector<8xf32>
    %23 = vector.shape_cast %22 : vector<8xf32> to vector<8x1xf32>
    %cst_12 = arith.constant 3.125000e-02 : f32
    %24 = vector.broadcast %cst_12 : f32 to vector<8x1xf32>
    %25 = arith.mulf %23, %24 : vector<8x1xf32>
    %cst_13 = arith.constant 9.99999996E-13 : f32
    %26 = vector.broadcast %cst_13 : f32 to vector<8x1xf32>
    %27 = arith.addf %25, %26 : vector<8x1xf32>
    %28 = math.rsqrt %27 : vector<8x1xf32>
    %29 = vector.broadcast %28 : vector<8x1xf32> to vector<8x128xf32>
    %30 = arith.mulf %20, %29 : vector<8x128xf32>
    %c0_14 = arith.constant 0 : index
    %c0_15 = arith.constant 0 : index
    %31 = vector.load %arg5[%c0_14, %c0_15] : memref<1x128xf32, #tpu.memory_space<vmem>>, vector<1x128xf32>
    %32 = vector.broadcast %31 : vector<1x128xf32> to vector<8x128xf32>
    %33 = arith.mulf %30, %32 : vector<8x128xf32>
    %c0_16 = arith.constant 0 : index
    %c0_17 = arith.constant 0 : index
    %34 = vector.load %arg6[%c0_16, %c0_17] : memref<1x128xf32, #tpu.memory_space<vmem>>, vector<1x128xf32>
    %35 = vector.broadcast %34 : vector<1x128xf32> to vector<8x128xf32>
    %36 = arith.addf %33, %35 : vector<8x128xf32>
    %c0_18 = arith.constant 0 : index
    %c0_19 = arith.constant 0 : index
    %37 = vector.load %arg7[%c0_18, %c0_19] : memref<8x128xf32, #tpu.memory_space<vmem>>, vector<8x128xf32>
    tpu.vector_store %arg7[%c0_18, %c0_19], %36 {strides = array<i32>} : memref<8x128xf32, #tpu.memory_space<vmem>>, vector<8x128xf32>,
    return
  }
  func.func @transform_0(%arg0: i32) -> (i32, i32) {
    %c0_i32 = arith.constant 0 : i32
    %c0_i32_0 = arith.constant 0 : i32
    return %arg0, %c0_i32 : i32, i32
  }
  func.func @transform_1(%arg0: i32) -> (i32, i32) {
    %c0_i32 = arith.constant 0 : i32
    %c0_i32_0 = arith.constant 0 : i32
    %c0_i32_1 = arith.constant 0 : i32
    return %c0_i32, %c0_i32_0 : i32, i32
  }
  func.func @transform_2(%arg0: i32) -> (i32, i32) {
    %c0_i32 = arith.constant 0 : i32
    %c0_i32_0 = arith.constant 0 : i32
    %c0_i32_1 = arith.constant 0 : i32
    return %c0_i32, %c0_i32_0 : i32, i32
  }
  func.func @transform_3(%arg0: i32) -> (i32, i32) {
    %c0_i32 = arith.constant 0 : i32
    %c0_i32_0 = arith.constant 0 : i32
    return %arg0, %c0_i32 : i32, i32
  }
  func.func @transform_4(%arg0: i32) -> (i32, i32) {
    %c0_i32 = arith.constant 0 : i32
    %c0_i32_0 = arith.constant 0 : i32
    %c0_i32_1 = arith.constant 0 : i32
    return %c0_i32, %c0_i32_0 : i32, i32
  }
  func.func @transform_5(%arg0: i32) -> (i32, i32) {
    %c0_i32 = arith.constant 0 : i32
    %c0_i32_0 = arith.constant 0 : i32
    %c0_i32_1 = arith.constant 0 : i32
    return %c0_i32, %c0_i32_0 : i32, i32
  }
  func.func @transform_6(%arg0: i32) -> (i32, i32) {
    %c0_i32 = arith.constant 0 : i32
    %c0_i32_0 = arith.constant 0 : i32
    return %arg0, %c0_i32 : i32, i32
  }
}

</mosaic_0001>

<bundles_post_ra>
// kernel: mol_trans_encoder_forward.13
= control target key start
LH: loop header
LB: loop body
LE: loop exit
PB: predicated region body
PF: predicated region fallthrough
CT: control target
= control target key end

     0   :  { %8 = vsyncpa [#allocation3], 0  ;;  %s389_s12 = smov 0   ;;  %s417_s0 = inlined_call_operand.vmem [shape: f32[16,128], index: 0, kind: input, shape index: {}]   ;;  %s418_s1 = inlined_call_operand.hbm [shape: f32[128,128], index: 1, kind: input, shape index: {}]   ;;  %s419_s2 = inlined_call_operand.vmem [shape: f32[1,128], index: 2, kind: input, shape index: {}]   ;;  %s420_s3 = inlined_call_operand.vmem [shape: f32[16,128], index: 3, kind: output, shape index: {}]  }
   0x1 LB: > { %s124_s15 = sshll.u32 %s418_s1, 4  ;;  %s398_s16 = sadd.s32 4294967295, %s364_s12   ;;  %s364_s12 = sphi %s389_s12, %s14_s12   ;;  %s125_s15 = int_to_ptr.hbm [resolvable:$true] %s124_s15 }
   0x2   : > { %p293_p0 = scmp.ge.s32.totalorder %s364_s12, 1  ;;  %p113_p1 = scmp.lt.s32.totalorder %s364_s12, 3 }
   0x3   : > { %p310_p2 = scmp.eq.s32.totalorder %s398_s16, 0  ;;  %s366_s17 = smov [#allocation2]  }
   0x4   : > { %p114_p3 = pnand %p293_p0, %p113_p1  ;;  %s126_s18 = sshll.u32 %s366_s17, 4  ;;  %s127_s18 = int_to_ptr.vmem [resolvable:$true] %s126_s18 }
   0x5   : > { %s367_s19 = smov 128   ;;  %s368_s20 = smov 8  }
   0x6   : > { %p306_p4 = pneg %p114_p3  ;;  %152 = sbr.rel (%p114_p3) target bundleno = 175 (0xaf), region = 32 }
   0x8   : > { %p307_p5 = pnand %p310_p2, %p306_p4 }
   0xa   : > { %309 = dma.hbm_to_vmem [thread:$0]  (!%p307_p5), %s125_s15, 2048, %s127_s18, [#allocation3], %s367_s19, %s367_s19, %s368_s20  }
   0xb   : > { %359 = dma.done.wait (%p310_p2), [#allocation3], 2048  }
   0xc   : > { %361 = vsyncadd (%p310_p2), [#allocation3], 4294965248  ;;  %v199_v0 = vld [vmem:[#allocation2 + $0x78] sm:$0xff]  ;;  %v198_v1 = vld [vmem:[#allocation2 + $0x70] sm:$0xff]  ;;  %p175_p6 = scmp.lt.s32.totalorder %s398_s16, 1 }
   0xd   : > { %204 = vmatpush.msra.mxu0 %v199_v0  ;;  %v197_v2 = vld [vmem:[#allocation2 + $0x68] sm:$0xff]  ;;  %v196_v3 = vld [vmem:[#allocation2 + $0x60] sm:$0xff]  ;;  %v195_v4 = vld [vmem:[#allocation2 + $0x58] sm:$0xff] }
   0xe   : > { %v194_v5 = vld [vmem:[#allocation2 + $0x50] sm:$0xff]  ;;  %v193_v6 = vld [vmem:[#allocation2 + $0x48] sm:$0xff]  ;;  %v192_v7 = vld [vmem:[#allocation2 + $0x40] sm:$0xff]  ;;  %s422_s16 = smov (!%p175_p6, %s398_s16), 1 }
   0xf   : > { %205 = vmatpush.msra.mxu0 %v198_v1  ;;  %v191_v8 = vld [vmem:[#allocation2 + $0x38] sm:$0xff]  ;;  %v190_v9 = vld [vmem:[#allocation2 + $0x30] sm:$0xff]  ;;  %v189_v10 = vld [vmem:[#allocation2 + $0x28] sm:$0xff]  ;;  %s298_s21 = sshll.u32 %s422_s16, 3 }
  0x10   : > { %v188_v11 = vld [vmem:[#allocation2 + $0x20] sm:$0xff]  ;;  %v187_v12 = vld [vmem:[#allocation2 + $0x18] sm:$0xff]  ;;  %v186_v13 = vld [vmem:[#allocation2 + $0x10] sm:$0xff]  ;;  %s178_s24 = scalar_lea.vmem %s417_s0, %s298_s21  ;;  %s182_s29 = scalar_lea.vmem %s420_s3, %s298_s21 }
  0x11   : > { %206 = vmatpush.msra.mxu0 %v197_v2  ;;  %v185_v14 = vld [vmem:[#allocation2 + $0x8] sm:$0xff]  ;;  %v184_v15 = vld [vmem:[#allocation2] sm:$0xff] }
  0x12   : > { %v183_v16 = vld [vmem:[%s178_s24] sm:$0xff] }
  0x13   : > { %207 = vmatpush.msra.mxu0 %v196_v3  ;;  %v323_v17 = vld [vmem:[%s419_s2] ss:$0 sm:$0xff] }
  0x15   : > { %208 = vmatpush.msra.mxu0 %v195_v4 }
  0x17   : > { %209 = vmatpush.msra.mxu0 %v194_v5 }
  0x19   : > { %210 = vmatpush.msra.mxu0 %v193_v6 }
  0x1b   : > { %211 = vmatpush.msra.mxu0 %v192_v7 }
  0x1d   : > { %212 = vmatpush.msra.mxu0 %v191_v8 }
  0x1f   : > { %213 = vmatpush.msra.mxu0 %v190_v9 }
  0x21   : > { %214 = vmatpush.msra.mxu0 %v189_v10 }
  0x23   : > { %215 = vmatpush.msra.mxu0 %v188_v11 }
  0x25   : > { %216 = vmatpush.msra.mxu0 %v187_v12 }
  0x27   : > { %217 = vmatpush.msra.mxu0 %v186_v13 }
  0x29   : > { %218 = vmatpush.msra.mxu0 %v185_v14 }
  0x2b   : > { %219 = vmatpush.msra.mxu0 %v184_v15 }
  0x2c   : > { %220 = vmatmul.f32.vlgmr.msra.gmra.mxu0 %v183_v16 }
  0xa9   : > { %v221_v18 = vpop.f32.mrf.mxu0 }
  0xaa   : > { %v222_v19 = vadd.f32 %v323_v17, %v221_v18 }
  0xac   : > { %v224_v20 = vmax.f32 %v222_v19, 0.0 }
  0xae   : > { %225 = vst [vmem:[%s182_s29] sm:$0xff] %v224_v20 }
  0xaf PF: > { %s14_s12 = sadd.s32 1, %s364_s12  }
  0xb0   : > { %p11_p7 = scmp.ge.s32.totalorder %s14_s12, 4  }
  0xb2   :  { %13 = sbr.rel (!%p11_p7) target bundleno = 1 (0x1), region = 67 }
  0xb7   :  { %245 = vsyncpa [#allocation3], 1 }
  0xb8   :  { %247 = vsyncpa [#allocation3 + $0x1], 1 }

// kernel: mol_trans_encoder_forward.11
= control target key start
LH: loop header
LB: loop body
LE: loop exit
PB: predicated region body
PF: predicated region fallthrough
CT: control target
= control target key end

     0   :  { %s764_s15 = smov 0   ;;  %s845_s0 = inlined_call_operand.vmem [shape: f32[2,8,128], index: 0, kind: input, shape index: {}]   ;;  %s846_s1 = inlined_call_operand.vmem [shape: f32[2,8,128], index: 1, kind: input, shape index: {}]   ;;  %s847_s2 = inlined_call_operand.vmem [shape: f32[2,8,128], index: 2, kind: input, shape index: {}]   ;;  %s848_s3 = inlined_call_operand.vmem [shape: f32[2,1,8], index: 3, kind: input, shape index: {}]   ;;  %s849_s4 = inlined_call_operand.vmem [shape: f32[2,8,128], index: 4, kind: output, shape index: {}]  }
   0x1 LB: > { %s671_s16 = sadd.s32 4294967295, %s731_s15   ;;  %p675_p0 = scmp.ge.s32.totalorder %s731_s15, 1  ;;  %s731_s15 = sphi %s764_s15, %s14_s15  }
   0x2   : > { %p187_p1 = scmp.lt.s32.totalorder %s731_s15, 3 }
   0x4   : > { %p188_p2 = pnand %p675_p0, %p187_p1 }
   0x5   : > { %p222_p3 = scmp.lt.s32.totalorder (!%p188_p2), %s671_s16, 1  ;;  %s733_s24 = smov (!%p188_p2), 120  }
   0x6   : > { %191 = sbr.rel (%p188_p2) target bundleno = 1065 (0x429), region = 36  ;;  %s734_s28 = smov (!%p188_p2), 112  }
   0x7   : > { %s735_s29 = smov (!%p188_p2), 104   ;;  %s736_s7 = smov (!%p188_p2), 24  }
   0x8   : > { %s737_s8 = smov (!%p188_p2), 8   ;;  %s738_s9 = smov (!%p188_p2), 16  }
   0xb   : > { %s851_s16 = smov (!%p222_p3, %s671_s16), 1  ;;  %vm245_vm0 = vcmask 64512  }
   0xc   : > { %s772_s17 = sshll.u32 %s851_s16, 3  ;;  %s236_s27 = scalar_lea.vmem %s848_s3, %s851_s16 }
   0xd   : > { %s229_s20 = scalar_lea.vmem %s846_s1, %s772_s17  ;;  %s225_s23 = scalar_lea.vmem %s845_s0, %s772_s17  ;;  %v794_v4 = vld [vmem:[%s236_s27] ss:$0 sm:$0xff] }
   0xe   : > { %v242_v0 = vld [vmem:[%s229_s20] sm:$0xff]  ;;  %s233_s6 = scalar_lea.vmem %s847_s2, %s772_s17  ;;  %s240_s12 = scalar_lea.vmem %s849_s4, %s772_s17 }
   0xf   : > { %680 = vmatpush.xpose.msk.msra.mxu0 %vm245_vm0, %v242_v0  ;;  %v241_v1 = vld [vmem:[%s225_s23] sm:$0xff]  ;;  %326 = vrot.lane.b32.xlu1 %v242_v0, %s733_s24 }
  0x10   : > { %407 = vrot.lane.b32.xlu2 %v242_v0, %s734_s28  ;;  %v808_v21 = vld [vmem:[%s233_s6] sm:$0xff] }
  0x11   : > { %319 = vmatpush.msra.mxu1 %v808_v21 }
  0x12   : > { %681 = vmatmul.msk.f32.vlgmr.msra.gmra.mxu0 %vm245_vm0, %v241_v1 }
  0x17   : > { %324 = vrot.lane.b32.xlu1 %v241_v1, %s733_s24 }
  0x18   : > { %487 = vrot.lane.b32.xlu2 %v242_v0, %s735_s29 }
  0x1f   : > { %485 = vrot.lane.b32.xlu1 %v241_v1, %s735_s29 }
  0x6a   : > { %v408_v9 = vpop.permute.xlu2 %407 }
  0x6b   : > { %686 = vmatpush.xpose.msk.msrb.mxu1 %vm245_vm0, %v408_v9 }
  0x72   : > { %v488_v10 = vpop.permute.xlu2 %487 }
  0x73   : > { %689 = vmatpush.xpose.msk.msrb.mxu0 %vm245_vm0, %v488_v10 }
  0x81   : > { %v327_v2 = vpop.permute.xlu1 %326 }
  0x82   : > { %683 = vmatpush.xpose.msk.msra.mxu2 %vm245_vm0, %v327_v2 }
  0x89   : > { %v325_v3 = vpop.permute.xlu1 %324 }
  0x8a   : > { %684 = vmatmul.msk.f32.vlgmr.msra.gmra.mxu2 %vm245_vm0, %v325_v3 }
  0x8f   : > { %v269_v5 = vpop.f32.mrf.mxu0 }
  0x90   : > { %v272_v6 = vmul.f32 0.35355338, %v269_v5 }
  0x91   : > { %v486_v11 = vpop.permute.xlu1 %485 }
  0x92   : > { %v276_v7 = vadd.f32 %v794_v4, %v272_v6  ;;  %690 = vmatmul.msk.f32.vlgmr.msrb.gmra.mxu0 %vm245_vm0, %v486_v11 }
  0x94   : > { %v277_v8 = vsel %vm245_vm0, %v276_v7, -inf }
  0x95   : > { %278 = vmax.xlane.f32.xlu0 %v277_v8 }
 0x108   : > { %v279_v12 = vpop.xlane.xlu0 %278 }
 0x109   : > { %v280_v13 = vsub.f32 %v276_v7, %v279_v12 }
 0x10b   : > { %v281_v14 = vmul.f32 1.442695, %v280_v13 }
 0x10d   : > { %709 = vpow2.f32 %v281_v14  ;;  %v349_v15 = vpop.f32.mrf.mxu2 }
 0x10e   : > { %v352_v16 = vmul.f32 0.35355338, %v349_v15 }
 0x10f   : > { %v510_v22 = vpop.f32.mrf.mxu0 }
 0x110   : > { %v353_v17 = vadd.f32 %v794_v4, %v352_v16  ;;  %v513_v23 = vmul.f32 0.35355338, %v510_v22 }
 0x112   : > { %v354_v18 = vsel %vm245_vm0, %v353_v17, -inf  ;;  %v514_v24 = vadd.f32 %v794_v4, %v513_v23 }
 0x113   : > { %v710_v19 = vpop.eup %709  ;;  %355 = vmax.xlane.f32.xlu2 %v354_v18 }
 0x114   : > { %v283_v20 = vsel %vm245_vm0, %v710_v19, 0.0  ;;  %v515_v25 = vsel %vm245_vm0, %v514_v24, -inf }
 0x115   : > { %284 = vadd.xlane.f32.xlu0 %v283_v20 }
 0x129   : > { %405 = vrot.lane.b32.xlu0 %v241_v1, %s734_s28 }
 0x153   : > { %516 = vmax.xlane.f32.xlu0 %v515_v25 }
 0x167   : > { %539 = vrot.lane.b32.xlu0 %v808_v21, %s735_s29 }
 0x186   : > { %v356_v26 = vpop.xlane.xlu2 %355 }
 0x187   : > { %v357_v27 = vsub.f32 %v353_v17, %v356_v26 }
 0x188   : > { %v285_v28 = vpop.xlane.xlu0 %284 }
 0x189   : > { %711 = vrcp.f32 %v285_v28  ;;  %v358_v29 = vmul.f32 1.442695, %v357_v27  ;;  %v297_v35 = vand.u32 2147483648, %v285_v28  ;;  %v295_v37 = vand.u32 2147483647, %v285_v28 }
 0x18a   : > { %vm291_vm2 = vweird.f32 %v285_v28 }
 0x18b   : > { %713 = vpow2.f32 %v358_v29  ;;  %v298_v39 = vor.u32 1.1754944e-38, %v297_v35  ;;  %vm296_vm4 = vcmp.eq.f32.partialorder %v295_v37, 8.507059e+37 }
 0x18f   : > { %v712_v30 = vpop.eup %711 }
 0x190   : > { %v287_v31 = vmul.f32 %v712_v30, %v285_v28  ;;  %vm292_vm1 = vweird.f32 %v712_v30 }
 0x191   : > { %v814_v32 = vpop.eup %713  ;;  %vm293_vm3 = vmor %vm291_vm2, %vm292_vm1  ;;  %vm578_vm2 = vcmask 130048  }
 0x192   : > { %v288_v33 = vsub.f32 1.0, %v287_v31  ;;  %v360_v34 = vsel %vm245_vm0, %v814_v32, 0.0 }
 0x193   : > { %361 = vadd.xlane.f32.xlu2 %v360_v34 }
 0x194   : > { %v289_v36 = vmul.f32 %v712_v30, %v288_v33 }
 0x196   : > { %v290_v38 = vadd.f32 %v712_v30, %v289_v36 }
 0x198   : > { %v294_v40 = vsel %vm293_vm3, %v712_v30, %v290_v38  ;;  %vm580_vm3 = vcmask 195584  }
 0x199   : > { %v299_v41 = vsel %vm296_vm4, %v298_v39, %v294_v40  ;;  %vm582_vm4 = vcmask 261120  }
 0x19a   : > { %v300_v42 = vmul.f32 %v710_v19, %v299_v41 }
 0x19b   : > { %v406_v43 = vpop.permute.xlu0 %405 }
 0x19c   : > { %682 = vmatmul.msk.f32.vlgmr.msra.gmra.mxu1 %vm245_vm0, %v300_v42 }
 0x1a4   : > { %687 = vmatmul.msk.f32.vlgmr.msrb.gmra.mxu1 %vm245_vm0, %v406_v43 }
 0x1c6   : > { %v517_v45 = vpop.xlane.xlu0 %516 }
 0x1c7   : > { %v518_v46 = vsub.f32 %v514_v24, %v517_v45 }
 0x1c9   : > { %v519_v47 = vmul.f32 1.442695, %v518_v46 }
 0x1cb   : > { %715 = vpow2.f32 %v519_v47 }
 0x1d1   : > { %v716_v52 = vpop.eup %715 }
 0x1d2   : > { %v521_v53 = vsel %vm245_vm0, %v716_v52, 0.0 }
 0x1d9   : > { %v540_v54 = vpop.permute.xlu0 %539 }
 0x1da   : > { %560 = vmatpush.msrb.mxu2 %v540_v54 }
 0x206   : > { %v362_v8 = vpop.xlane.xlu2 %361 }
 0x207   : > { %vm368_vm9 = vweird.f32 %v362_v8  ;;  %v374_v13 = vand.u32 2147483648, %v362_v8  ;;  %v372_v15 = vand.u32 2147483647, %v362_v8 }
 0x209   : > { %v375_v17 = vor.u32 1.1754944e-38, %v374_v13  ;;  %vm373_vm12 = vcmp.eq.f32.partialorder %v372_v15, 8.507059e+37 }
 0x219   : > { %v822_v44 = vpop.f32.mrf.mxu1 }
 0x221   : > { %v430_v48 = vpop.f32.mrf.mxu1 }
 0x222   : > { %v433_v49 = vmul.f32 0.35355338, %v430_v48 }
 0x224   : > { %v434_v50 = vadd.f32 %v794_v4, %v433_v49 }
 0x226   : > { %v435_v51 = vsel %vm245_vm0, %v434_v50, -inf }
 0x227   : > { %436 = vmax.xlane.f32.xlu1 %v435_v51 }
 0x22f   : > { %522 = vadd.xlane.f32.xlu1 %v521_v53 }
 0x248   : > { %459 = vrot.lane.b32.xlu1 %v808_v21, %s734_s28 }
 0x29a   : > { %v437_v55 = vpop.xlane.xlu1 %436 }
 0x29b   : > { %v438_v56 = vsub.f32 %v434_v50, %v437_v55 }
 0x29d   : > { %v439_v57 = vmul.f32 1.442695, %v438_v56 }
 0x29f   : > { %717 = vpow2.f32 %v439_v57 }
 0x2a2   : > { %v523_v58 = vpop.xlane.xlu1 %522 }
 0x2a3   : > { %719 = vrcp.f32 %v523_v58  ;;  %v535_v0 = vand.u32 2147483648, %v523_v58  ;;  %v533_v2 = vand.u32 2147483647, %v523_v58  ;;  %vm529_vm6 = vweird.f32 %v523_v58 }
 0x2a4   : > { %721 = vrcp.f32 %v362_v8 }
 0x2a5   : > { %v718_v59 = vpop.eup %717  ;;  %v536_v4 = vor.u32 1.1754944e-38, %v535_v0  ;;  %vm534_vm8 = vcmp.eq.f32.partialorder %v533_v2, 8.507059e+37 }
 0x2a6   : > { %v441_v60 = vsel %vm245_vm0, %v718_v59, 0.0 }
 0x2a7   : > { %442 = vadd.xlane.f32.xlu2 %v441_v60 }
 0x2a9   : > { %v720_v61 = vpop.eup %719 }
 0x2aa   : > { %v525_v62 = vmul.f32 %v720_v61, %v523_v58  ;;  %vm530_vm5 = vweird.f32 %v720_v61  ;;  %v722_v9 = vpop.eup %721 }
 0x2ab   : > { %vm531_vm7 = vmor %vm529_vm6, %vm530_vm5  ;;  %v364_v10 = vmul.f32 %v722_v9, %v362_v8  ;;  %vm369_vm10 = vweird.f32 %v722_v9 }
 0x2ac   : > { %v526_v63 = vsub.f32 1.0, %v525_v62  ;;  %vm370_vm11 = vmor %vm368_vm9, %vm369_vm10 }
 0x2ad   : > { %v365_v11 = vsub.f32 1.0, %v364_v10 }
 0x2ae   : > { %v527_v1 = vmul.f32 %v720_v61, %v526_v63 }
 0x2af   : > { %v366_v12 = vmul.f32 %v722_v9, %v365_v11 }
 0x2b0   : > { %v528_v3 = vadd.f32 %v720_v61, %v527_v1 }
 0x2b1   : > { %v367_v14 = vadd.f32 %v722_v9, %v366_v12 }
 0x2b2   : > { %v532_v5 = vsel %vm531_vm7, %v720_v61, %v528_v3 }
 0x2b3   : > { %v537_v6 = vsel %vm534_vm8, %v536_v4, %v532_v5  ;;  %v371_v18 = vsel %vm370_vm11, %v722_v9, %v367_v14 }
 0x2b4   : > { %v538_v7 = vmul.f32 %v716_v52, %v537_v6  ;;  %v376_v19 = vsel %vm373_vm12, %v375_v17, %v371_v18 }
 0x2b5   : > { %v377_v23 = vmul.f32 %v814_v32, %v376_v19 }
 0x2b6   : > { %691 = vmatmul.msk.f32.vlgmr.msrb.gmra.mxu2 %vm245_vm0, %v538_v7 }
 0x2ba   : > { %v460_v24 = vpop.permute.xlu1 %459 }
 0x2bf   : > { %379 = vrot.lane.b32.xlu2 %v808_v21, %s733_s24 }
 0x31a   : > { %v443_v16 = vpop.xlane.xlu2 %442 }
 0x31b   : > { %723 = vrcp.f32 %v443_v16  ;;  %v455_v26 = vand.u32 2147483648, %v443_v16  ;;  %v453_v28 = vand.u32 2147483647, %v443_v16  ;;  %vm449_vm14 = vweird.f32 %v443_v16 }
 0x31d   : > { %v456_v30 = vor.u32 1.1754944e-38, %v455_v26  ;;  %vm454_vm1 = vcmp.eq.f32.partialorder %v453_v28, 8.507059e+37 }
 0x321   : > { %v724_v20 = vpop.eup %723 }
 0x322   : > { %v445_v21 = vmul.f32 %v724_v20, %v443_v16  ;;  %v380_v22 = vpop.permute.xlu2 %379  ;;  %vm450_vm13 = vweird.f32 %v724_v20 }
 0x323   : > { %400 = vmatpush.msra.mxu3 %v380_v22  ;;  %vm451_vm15 = vmor %vm449_vm14, %vm450_vm13 }
 0x324   : > { %v446_v25 = vsub.f32 1.0, %v445_v21  ;;  %685 = vmatmul.msk.f32.vlgmr.msra.gmra.mxu3 %vm245_vm0, %v377_v23 }
 0x325   : > { %480 = vmatpush.msrb.mxu3 %v460_v24 }
 0x326   : > { %v447_v27 = vmul.f32 %v724_v20, %v446_v25 }
 0x328   : > { %v448_v29 = vadd.f32 %v724_v20, %v447_v27 }
 0x32a   : > { %v452_v31 = vsel %vm451_vm15, %v724_v20, %v448_v29 }
 0x32b   : > { %v457_v33 = vsel %vm454_vm1, %v456_v30, %v452_v31 }
 0x32c   : > { %v458_v34 = vmul.f32 %v718_v59, %v457_v33 }
 0x32e   : > { %688 = vmatmul.msk.f32.vlgmr.msrb.gmra.mxu3 %vm245_vm0, %v458_v34 }
 0x339   : > { %v562_v32 = vpop.f32.mrf.mxu2 }
 0x33a   : > { %574 = vrot.lane.b32.xlu1 %v562_v32, %s736_s7 }
 0x3a7   : > { %v402_v35 = vpop.f32.mrf.mxu3 }
 0x3a8   : > { %566 = vrot.lane.b32.xlu2 %v402_v35, %s737_s8 }
 0x3ac   : > { %v575_v40 = vpop.permute.xlu1 %574 }
 0x3b1   : > { %v482_v36 = vpop.f32.mrf.mxu3 }
 0x3b2   : > { %570 = vrot.lane.b32.xlu0 %v482_v36, %s738_s9 }
 0x402   : > { %v567_v37 = vpop.permute.xlu2 %566 }
 0x403   : > { %v577_v38 = vsel %vm245_vm0, %v822_v44, %v567_v37 }
 0x424   : > { %v571_v39 = vpop.permute.xlu0 %570 }
 0x425   : > { %v579_v41 = vsel %vm578_vm2, %v577_v38, %v571_v39 }
 0x426   : > { %v581_v42 = vsel %vm580_vm3, %v579_v41, %v575_v40 }
 0x427   : > { %v583_v43 = vsel %vm582_vm4, %v581_v42, 0.0 }
 0x428   : > { %584 = vst [vmem:[%s240_s12] sm:$0xff] %v583_v43 }
 0x429 PF: > { %s14_s15 = sadd.s32 1, %s731_s15  }
 0x42a   : > { %p11_p4 = scmp.ge.s32.totalorder %s14_s15, 4  }
 0x42c   :  { %13 = sbr.rel (!%p11_p4) target bundleno = 1 (0x1), region = 75 }

// kernel: mol_trans_encoder_forward.10
= control target key start
LH: loop header
LB: loop body
LE: loop exit
PB: predicated region body
PF: predicated region fallthrough
CT: control target
= control target key end

     0   :  { %8 = vsyncpa [#allocation3], 0  ;;  %s558_s12 = smov 0   ;;  %s560_s13 = smov 0   ;;  %s628_s0 = inlined_call_operand.vmem [shape: f32[16,128], index: 0, kind: input, shape index: {}]   ;;  %s629_s1 = inlined_call_operand.hbm [shape: f32[3,128,128], index: 1, kind: input, shape index: {}]   ;;  %s630_s2 = inlined_call_operand.vmem [shape: f32[3,1,128], index: 2, kind: input, shape index: {}]   ;;  %s631_s3 = inlined_call_operand.vmem [shape: f32[3,16,128], index: 3, kind: output, shape index: {}]  }
   0x1   :  { %s562_s14 = smov 0  }
   0x2 LB: > { %s571_s15 = sadd.s32 4294967295, %s533_s14   ;;  %s573_s16 = sadd.s32 1, %s533_s14   ;;  %s533_s14 = sphi %s562_s14, %s635_s14   ;;  %s529_s13 = sphi %s560_s13, %s634_s13   ;;  %s525_s12 = sphi %s558_s12, %s633_s12  }
   0x3   : > { %s86_s17 = ssub.s32 %s533_s14, %s573_s16  ;;  %s89_s18 = sadd.s32 1, %s529_s13 }
   0x4   : > { %p87_p0 = scmp.eq.s32.totalorder %s86_s17, 0  ;;  %p99_p1 = scmp.ne.s32.totalorder %s529_s13, %s525_s12 }
   0x5   : > { %p100_p2 = scmp.eq.s32.totalorder %s571_s15, 1  ;;  %p423_p3 = scmp.ge.s32.totalorder %s533_s14, 1 }
   0x6   : > { %s581_s19 = scalar_select %p87_p0, %s529_s13, %s89_s18  }
   0x7   : > { %p583_p4 = por %p100_p2, %p99_p1  ;;  %p113_p5 = scmp.lt.s32.totalorder %s533_s14, 3 }
   0x8   : > { %p445_p6 = scmp.eq.s32.totalorder %s571_s15, 0  ;;  %s124_s23 = sshll.u32 %s629_s1, 4  ;;  %s125_s23 = int_to_ptr.hbm [resolvable:$true] %s124_s23 }
   0x9   : > { %p114_p7 = pnand %p423_p3, %p113_p5  ;;  %s535_s24 = smov [#allocation2]  }
   0xa   : > { %s126_s25 = sshll.u32 %s535_s24, 4  ;;  %s536_s26 = smov 128   ;;  %s127_s25 = int_to_ptr.vmem [resolvable:$true] %s126_s25 }
   0xb   : > { %p441_p8 = pneg %p114_p7  ;;  %s537_s27 = smov 8  }
   0xc   : > { %152 = sbr.rel (%p114_p7) target bundleno = 193 (0xc1), region = 32 }
   0xd   : > { %p442_p9 = pnand %p445_p6, %p441_p8 }
   0xf   : > { %444 = dma.hbm_to_vmem [thread:$0]  (!%p442_p9), %s125_s23, 6144, %s127_s25, [#allocation3], %s536_s26, %s536_s26, %s537_s27  }
  0x11   : > { %520 = dma.done.wait (%p445_p6), [#allocation3], 6144  }
  0x12   : > { %522 = vsyncadd (%p445_p6), [#allocation3], 4294961152  ;;  %v281_v0 = vld [vmem:[#allocation2 + $0x178] sm:$0xff]  ;;  %v280_v1 = vld [vmem:[#allocation2 + $0x170] sm:$0xff]  ;;  %p175_p10 = scmp.lt.s32.totalorder %s571_s15, 1  ;;  %s172_s6 = sand.u32 1, %s525_s12  }
  0x13   : > { %287 = vmatpush.msra.mxu2 %v281_v0  ;;  %v195_v2 = vld [vmem:[#allocation2 + $0x78] sm:$0xff]  ;;  %v279_v4 = vld [vmem:[#allocation2 + $0x168] sm:$0xff]  ;;  %v194_v5 = vld [vmem:[#allocation2 + $0x70] sm:$0xff]  ;;  %s436_s7 = smul.u32 24, %s172_s6  ;;  %s433_s12 = sshll.u32 (%p583_p4), %s571_s15, 3 }
  0x14   : > { %v237_v3 = vld [vmem:[#allocation2 + $0xf8] sm:$0xff]  ;;  %200 = vmatpush.msra.mxu0 %v195_v2  ;;  %v236_v6 = vld [vmem:[#allocation2 + $0xf0] sm:$0xff]  ;;  %v193_v7 = vld [vmem:[#allocation2 + $0x68] sm:$0xff]  ;;  %s176_s28 = scalar_select %p175_p10, %s571_s15, 1 }
  0x15   : > { %243 = vmatpush.msra.mxu1 %v237_v3  ;;  %288 = vmatpush.msra.mxu2 %v280_v1  ;;  %v235_v8 = vld [vmem:[#allocation2 + $0xe8] sm:$0xff]  ;;  %v278_v9 = vld [vmem:[#allocation2 + $0x160] sm:$0xff]  ;;  %v277_v12 = vld [vmem:[#allocation2 + $0x158] sm:$0xff]  ;;  %s174_s18 = scalar_lea.vmem [#allocation4], %s436_s7  ;;  %s317_s23 = scalar_lea.vmem (%p583_p4), %s631_s3, %s433_s12 }
  0x16   : > { %201 = vmatpush.msra.mxu0 %v194_v5  ;;  %v192_v10 = vld [vmem:[#allocation2 + $0x60] sm:$0xff]  ;;  %v191_v13 = vld [vmem:[#allocation2 + $0x58] sm:$0xff]  ;;  %v276_v15 = vld [vmem:[#allocation2 + $0x150] sm:$0xff]  ;;  %s428_s29 = sshll.u32 %s176_s28, 3 }
  0x17   : > { %244 = vmatpush.msra.mxu1 %v236_v6  ;;  %289 = vmatpush.msra.mxu2 %v279_v4  ;;  %v234_v11 = vld [vmem:[#allocation2 + $0xe0] sm:$0xff]  ;;  %v233_v14 = vld [vmem:[#allocation2 + $0xd8] sm:$0xff]  ;;  %v190_v16 = vld [vmem:[#allocation2 + $0x50] sm:$0xff]  ;;  %s178_s5 = scalar_lea.vmem %s628_s0, %s428_s29 }
  0x18   : > { %202 = vmatpush.msra.mxu0 %v193_v7  ;;  %v232_v17 = vld [vmem:[#allocation2 + $0xd0] sm:$0xff]  ;;  %v275_v18 = vld [vmem:[#allocation2 + $0x148] sm:$0xff]  ;;  %v274_v21 = vld [vmem:[#allocation2 + $0x140] sm:$0xff] }
  0x19   : > { %245 = vmatpush.msra.mxu1 %v235_v8  ;;  %290 = vmatpush.msra.mxu2 %v278_v9  ;;  %v189_v19 = vld [vmem:[#allocation2 + $0x48] sm:$0xff]  ;;  %v188_v22 = vld [vmem:[#allocation2 + $0x40] sm:$0xff]  ;;  %v273_v24 = vld [vmem:[#allocation2 + $0x138] sm:$0xff] }
  0x1a   : > { %203 = vmatpush.msra.mxu0 %v192_v10  ;;  %v231_v20 = vld [vmem:[#allocation2 + $0xc8] sm:$0xff]  ;;  %v230_v23 = vld [vmem:[#allocation2 + $0xc0] sm:$0xff]  ;;  %v187_v25 = vld [vmem:[#allocation2 + $0x38] sm:$0xff] }
  0x1b   : > { %246 = vmatpush.msra.mxu1 %v234_v11  ;;  %291 = vmatpush.msra.mxu2 %v277_v12  ;;  %v229_v26 = vld [vmem:[#allocation2 + $0xb8] sm:$0xff]  ;;  %v272_v27 = vld [vmem:[#allocation2 + $0x130] sm:$0xff]  ;;  %v271_v30 = vld [vmem:[#allocation2 + $0x128] sm:$0xff] }
  0x1c   : > { %204 = vmatpush.msra.mxu0 %v191_v13  ;;  %v186_v28 = vld [vmem:[#allocation2 + $0x30] sm:$0xff]  ;;  %v185_v31 = vld [vmem:[#allocation2 + $0x28] sm:$0xff]  ;;  %v270_v33 = vld [vmem:[#allocation2 + $0x120] sm:$0xff] }
  0x1d   : > { %247 = vmatpush.msra.mxu1 %v233_v14  ;;  %292 = vmatpush.msra.mxu2 %v276_v15  ;;  %v228_v29 = vld [vmem:[#allocation2 + $0xb0] sm:$0xff]  ;;  %v227_v32 = vld [vmem:[#allocation2 + $0xa8] sm:$0xff]  ;;  %v184_v34 = vld [vmem:[#allocation2 + $0x20] sm:$0xff] }
  0x1e   : > { %205 = vmatpush.msra.mxu0 %v190_v16  ;;  %v226_v35 = vld [vmem:[#allocation2 + $0xa0] sm:$0xff]  ;;  %v269_v36 = vld [vmem:[#allocation2 + $0x118] sm:$0xff]  ;;  %v268_v39 = vld [vmem:[#allocation2 + $0x110] sm:$0xff] }
  0x1f   : > { %248 = vmatpush.msra.mxu1 %v232_v17  ;;  %293 = vmatpush.msra.mxu2 %v275_v18  ;;  %v183_v37 = vld [vmem:[#allocation2 + $0x18] sm:$0xff]  ;;  %v182_v40 = vld [vmem:[#allocation2 + $0x10] sm:$0xff]  ;;  %v267_v42 = vld [vmem:[#allocation2 + $0x108] sm:$0xff] }
  0x20   : > { %206 = vmatpush.msra.mxu0 %v189_v19  ;;  %v225_v38 = vld [vmem:[#allocation2 + $0x98] sm:$0xff]  ;;  %v224_v41 = vld [vmem:[#allocation2 + $0x90] sm:$0xff]  ;;  %v181_v43 = vld [vmem:[#allocation2 + $0x8] sm:$0xff] }
  0x21   : > { %249 = vmatpush.msra.mxu1 %v231_v20  ;;  %294 = vmatpush.msra.mxu2 %v274_v21  ;;  %v223_v44 = vld [vmem:[#allocation2 + $0x88] sm:$0xff]  ;;  %v266_v45 = vld [vmem:[#allocation2 + $0x100] sm:$0xff] }
  0x22   : > { %207 = vmatpush.msra.mxu0 %v188_v22  ;;  %v179_v46 = vld [vmem:[%s178_s5] sm:$0xff] }
  0x23   : > { %250 = vmatpush.msra.mxu1 %v230_v23  ;;  %295 = vmatpush.msra.mxu2 %v273_v24  ;;  %v180_v47 = vld [vmem:[#allocation2] sm:$0xff] }
  0x24   : > { %208 = vmatpush.msra.mxu0 %v187_v25  ;;  %v222_v48 = vld [vmem:[#allocation2 + $0x80] sm:$0xff] }
  0x25   : > { %251 = vmatpush.msra.mxu1 %v229_v26  ;;  %296 = vmatpush.msra.mxu2 %v272_v27  ;;  %v474_v49 = vld [vmem:[%s630_s2] ss:$0 sm:$0xff]  ;;  %v475_v50 = vld [vmem:[%s630_s2 + $0x1] ss:$0 sm:$0xff]  ;;  %v476_v55 = vld [vmem:[%s630_s2 + $0x2] ss:$0 sm:$0xff] }
  0x26   : > { %209 = vmatpush.msra.mxu0 %v186_v28 }
  0x27   : > { %252 = vmatpush.msra.mxu1 %v228_v29  ;;  %297 = vmatpush.msra.mxu2 %v271_v30 }
  0x28   : > { %210 = vmatpush.msra.mxu0 %v185_v31 }
  0x29   : > { %253 = vmatpush.msra.mxu1 %v227_v32  ;;  %298 = vmatpush.msra.mxu2 %v270_v33 }
  0x2a   : > { %211 = vmatpush.msra.mxu0 %v184_v34 }
  0x2b   : > { %254 = vmatpush.msra.mxu1 %v226_v35  ;;  %299 = vmatpush.msra.mxu2 %v269_v36 }
  0x2c   : > { %212 = vmatpush.msra.mxu0 %v183_v37 }
  0x2d   : > { %255 = vmatpush.msra.mxu1 %v225_v38  ;;  %300 = vmatpush.msra.mxu2 %v268_v39 }
  0x2e   : > { %213 = vmatpush.msra.mxu0 %v182_v40 }
  0x2f   : > { %256 = vmatpush.msra.mxu1 %v224_v41  ;;  %301 = vmatpush.msra.mxu2 %v267_v42 }
  0x30   : > { %214 = vmatpush.msra.mxu0 %v181_v43 }
  0x31   : > { %257 = vmatpush.msra.mxu1 %v223_v44  ;;  %302 = vmatpush.msra.mxu2 %v266_v45 }
  0x32   : > { %303 = vmatmul.f32.vlgmr.msra.gmra.mxu2 %v179_v46  ;;  %215 = vmatpush.msra.mxu0 %v180_v47 }
  0x33   : > { %258 = vmatpush.msra.mxu1 %v222_v48  ;;  %216 = vmatmul.f32.vlgmr.msra.gmra.mxu0 %v179_v46 }
  0x34   : > { %259 = vmatmul.f32.vlgmr.msra.gmra.mxu1 %v179_v46 }
  0xb0   : > { %v217_v51 = vpop.f32.mrf.mxu0 }
  0xb1   : > { %v218_v52 = vadd.f32 %v474_v49, %v217_v51  ;;  %v260_v53 = vpop.f32.mrf.mxu1 }
  0xb2   : > { %v261_v54 = vadd.f32 %v475_v50, %v260_v53 }
  0xb3   : > { %220 = vst [vmem:[%s174_s18] sm:$0xff] %v218_v52 }
  0xb4   : > { %430 = vst [vmem:[%s174_s18 + $0x8] sm:$0xff] %v261_v54  ;;  %315 = sbr.rel (!%p583_p4) target bundleno = 193 (0xc1), region = 40 }
  0xb5   : > { %v304_v56 = vpop.f32.mrf.mxu2 }
  0xb6   : > { %v305_v57 = vadd.f32 %v476_v55, %v304_v56 }
  0xb8   : > { %432 = vst [vmem:[%s174_s18 + $0x10] sm:$0xff] %v305_v57 }
  0xba   : > { %v350_v58 = vld [vmem:[%s174_s18] sm:$0xff] }
  0xbb   : > { %v352_v59 = vld [vmem:[%s174_s18 + $0x8] sm:$0xff]  ;;  %351 = vst [vmem:[%s317_s23] sm:$0xff] %v350_v58 }
  0xbc   : > { %353 = vst [vmem:[%s317_s23 + $0x10] sm:$0xff] %v352_v59 }
  0xbf   : > { %v354_v60 = vld [vmem:[%s174_s18 + $0x10] sm:$0xff] }
  0xc0   : > { %355 = vst [vmem:[%s317_s23 + $0x20] sm:$0xff] %v354_v60 }
  0xc1 PF: > { %p11_p11 = scmp.ge.s32.totalorder %s573_s16, 4   ;;  %s633_s12 = smov %s529_s13 }
  0xc2   : > { %s634_s13 = smov %s581_s19  ;;  %s635_s14 = smov %s573_s16 }
  0xc3   :  { %13 = sbr.rel (!%p11_p11) target bundleno = 2 (0x2), region = 111 }
  0xc8   :  { %371 = vsyncpa [#allocation3], 1 }
  0xc9   :  { %373 = vsyncpa [#allocation3 + $0x1], 1 }

// kernel: mol_trans_encoder_forward.12
= control target key start
LH: loop header
LB: loop body
LE: loop exit
PB: predicated region body
PF: predicated region fallthrough
CT: control target
= control target key end

     0   :  { %s474_s21 = smov 0   ;;  %s556_s0 = inlined_call_operand.vmem [shape: f32[16,128], index: 0, kind: input, shape index: {}]   ;;  %s557_s1 = inlined_call_operand.vmem [shape: f32[128,128], index: 1, kind: input, shape index: {}]   ;;  %s558_s2 = inlined_call_operand.vmem [shape: f32[1,128], index: 2, kind: input, shape index: {}]   ;;  %s559_s3 = inlined_call_operand.vmem [shape: f32[16,128], index: 3, kind: input, shape index: {}]   ;;  %s560_s4 = inlined_call_operand.vmem [shape: f32[1,128], index: 4, kind: input, shape index: {}]   ;;  %s561_s5 = inlined_call_operand.vmem [shape: f32[1,128], index: 5, kind: input, shape index: {}]   ;;  %s562_s6 = inlined_call_operand.vmem [shape: f32[16,128], index: 6, kind: output, shape index: {}]  }
   0x1 LB: > { %s408_s22 = sadd.s32 4294967295, %s437_s21   ;;  %p412_p0 = scmp.ge.s32.totalorder %s437_s21, 1  ;;  %s437_s21 = sphi %s474_s21, %s16_s21  }
   0x2   : > { %p220_p1 = scmp.lt.s32.totalorder %s437_s21, 3 }
   0x4   : > { %p221_p2 = pnand %p412_p0, %p220_p1 }
   0x5   : > { %p252_p3 = scmp.lt.s32.totalorder (!%p221_p2), %s408_s22, 1 }
   0x6   : > { %224 = sbr.rel (%p221_p2) target bundleno = 442 (0x1ba), region = 44 }
   0xb   : > { %v280_v0 = vld [vmem:[%s557_s1 + $0x78] sm:$0xff]  ;;  %v279_v1 = vld [vmem:[%s557_s1 + $0x70] sm:$0xff]  ;;  %v278_v2 = vld [vmem:[%s557_s1 + $0x68] sm:$0xff]  ;;  %s564_s22 = smov (!%p252_p3, %s408_s22), 1  ;;  %v307_v17 = vlaneseq }
   0xc   : > { %285 = vmatpush.msra.mxu0 %v280_v0  ;;  %v277_v3 = vld [vmem:[%s557_s1 + $0x60] sm:$0xff]  ;;  %v276_v4 = vld [vmem:[%s557_s1 + $0x58] sm:$0xff]  ;;  %v275_v5 = vld [vmem:[%s557_s1 + $0x50] sm:$0xff]  ;;  %s521_s27 = sshll.u32 %s564_s22, 3 }
   0xd   : > { %v274_v6 = vld [vmem:[%s557_s1 + $0x48] sm:$0xff]  ;;  %v273_v7 = vld [vmem:[%s557_s1 + $0x40] sm:$0xff]  ;;  %v272_v8 = vld [vmem:[%s557_s1 + $0x38] sm:$0xff]  ;;  %s255_s10 = scalar_lea.vmem %s556_s0, %s521_s27  ;;  %s259_s16 = scalar_lea.vmem %s559_s3, %s521_s27  ;;  %v308_v19 = vand.u32 127, %v307_v17 }
   0xe   : > { %286 = vmatpush.msra.mxu0 %v279_v1  ;;  %v271_v9 = vld [vmem:[%s557_s1 + $0x30] sm:$0xff]  ;;  %v270_v10 = vld [vmem:[%s557_s1 + $0x28] sm:$0xff]  ;;  %v269_v11 = vld [vmem:[%s557_s1 + $0x20] sm:$0xff]  ;;  %s263_s25 = scalar_lea.vmem %s562_s6, %s521_s27 }
   0xf   : > { %v268_v12 = vld [vmem:[%s557_s1 + $0x18] sm:$0xff]  ;;  %v267_v13 = vld [vmem:[%s557_s1 + $0x10] sm:$0xff]  ;;  %v266_v14 = vld [vmem:[%s557_s1 + $0x8] sm:$0xff]  ;;  %vm309_vm0 = vcmp.lt.s32.totalorder %v308_v19, 32 }
  0x10   : > { %287 = vmatpush.msra.mxu0 %v278_v2  ;;  %v265_v15 = vld [vmem:[%s557_s1] sm:$0xff] }
  0x11   : > { %v264_v16 = vld [vmem:[%s255_s10] sm:$0xff] }
  0x12   : > { %288 = vmatpush.msra.mxu0 %v277_v3  ;;  %v426_v18 = vld [vmem:[%s558_s2] ss:$0 sm:$0xff] }
  0x13   : > { %v305_v21 = vld [vmem:[%s259_s16] sm:$0xff] }
  0x14   : > { %289 = vmatpush.msra.mxu0 %v276_v4  ;;  %v427_v39 = vld [vmem:[%s560_s4] ss:$0 sm:$0xff] }
  0x15   : > { %v428_v41 = vld [vmem:[%s561_s5] ss:$0 sm:$0xff] }
  0x16   : > { %290 = vmatpush.msra.mxu0 %v275_v5 }
  0x18   : > { %291 = vmatpush.msra.mxu0 %v274_v6 }
  0x1a   : > { %292 = vmatpush.msra.mxu0 %v273_v7 }
  0x1c   : > { %293 = vmatpush.msra.mxu0 %v272_v8 }
  0x1e   : > { %294 = vmatpush.msra.mxu0 %v271_v9 }
  0x20   : > { %295 = vmatpush.msra.mxu0 %v270_v10 }
  0x22   : > { %296 = vmatpush.msra.mxu0 %v269_v11 }
  0x24   : > { %297 = vmatpush.msra.mxu0 %v268_v12 }
  0x26   : > { %298 = vmatpush.msra.mxu0 %v267_v13 }
  0x28   : > { %299 = vmatpush.msra.mxu0 %v266_v14 }
  0x2a   : > { %300 = vmatpush.msra.mxu0 %v265_v15 }
  0x2b   : > { %301 = vmatmul.f32.vlgmr.msra.gmra.mxu0 %v264_v16 }
  0xa8   : > { %v302_v20 = vpop.f32.mrf.mxu0 }
  0xa9   : > { %v303_v22 = vadd.f32 %v426_v18, %v302_v20 }
  0xab   : > { %v306_v23 = vadd.f32 %v305_v21, %v303_v22 }
  0xad   : > { %v310_v24 = vsel %vm309_vm0, %v306_v23, 0.0 }
  0xae   : > { %311 = vadd.xlane.f32.xlu0 %v310_v24 }
 0x121   : > { %v312_v25 = vpop.xlane.xlu0 %311 }
 0x122   : > { %v313_v26 = vmul.f32 0.03125, %v312_v25 }
 0x124   : > { %v314_v27 = vsub.f32 %v310_v24, %v313_v26 }
 0x126   : > { %v315_v28 = vsel %vm309_vm0, %v314_v27, 0.0 }
 0x127   : > { %v316_v29 = vmul.f32 %v315_v28, %v315_v28 }
 0x129   : > { %317 = vadd.xlane.f32.xlu0 %v316_v29 }
 0x19c   : > { %v318_v30 = vpop.xlane.xlu0 %317 }
 0x19d   : > { %v319_v31 = vmul.f32 0.03125, %v318_v30 }
 0x19f   : > { %v320_v32 = vadd.f32 1e-12, %v319_v31 }
 0x1a1   : > { %429 = vrsqrt.f32 %v320_v32  ;;  %vm327_vm2 = vweird.f32 %v320_v32 }
 0x1a7   : > { %v430_v33 = vpop.eup %429 }
 0x1a8   : > { %v322_v34 = vmul.f32 %v430_v33, %v320_v32  ;;  %vm328_vm1 = vweird.f32 %v430_v33 }
 0x1a9   : > { %vm329_vm3 = vmor %vm327_vm2, %vm328_vm1 }
 0x1aa   : > { %v323_v35 = vmul.f32 %v430_v33, %v322_v34 }
 0x1ac   : > { %v324_v36 = vmul.f32 0.5, %v323_v35 }
 0x1ae   : > { %v325_v37 = vsub.f32 1.5, %v324_v36 }
 0x1b0   : > { %v326_v38 = vmul.f32 %v430_v33, %v325_v37 }
 0x1b2   : > { %v330_v40 = vsel %vm329_vm3, %v430_v33, %v326_v38 }
 0x1b3   : > { %v331_v42 = vmul.f32 %v330_v40, %v315_v28 }
 0x1b5   : > { %v336_v43 = vmul.f32 %v427_v39, %v331_v42 }
 0x1b7   : > { %v341_v44 = vadd.f32 %v428_v41, %v336_v43 }
 0x1b9   : > { %342 = vst [vmem:[%s263_s25] sm:$0xff] %v341_v44 }
 0x1ba PF: > { %s16_s21 = sadd.s32 1, %s437_s21  }
 0x1bb   : > { %p13_p4 = scmp.ge.s32.totalorder %s16_s21, 4  }
 0x1bd   :  { %15 = sbr.rel (!%p13_p4) target bundleno = 1 (0x1), region = 77 }

// kernel: mol_trans_encoder_forward.14
= control target key start
LH: loop header
LB: loop body
LE: loop exit
PB: predicated region body
PF: predicated region fallthrough
CT: control target
= control target key end

     0   :  { %11 = vsyncpa [#allocation3], 0  ;;  %s555_s21 = smov 0   ;;  %s597_s0 = inlined_call_operand.vmem [shape: f32[16,128], index: 0, kind: input, shape index: {}]   ;;  %s598_s1 = inlined_call_operand.hbm [shape: f32[128,128], index: 1, kind: input, shape index: {}]   ;;  %s599_s2 = inlined_call_operand.vmem [shape: f32[1,128], index: 2, kind: input, shape index: {}]   ;;  %s600_s3 = inlined_call_operand.vmem [shape: f32[16,128], index: 3, kind: input, shape index: {}]   ;;  %s601_s4 = inlined_call_operand.vmem [shape: f32[1,128], index: 4, kind: input, shape index: {}]   ;;  %s602_s5 = inlined_call_operand.vmem [shape: f32[1,128], index: 5, kind: input, shape index: {}]   ;;  %s603_s6 = inlined_call_operand.vmem [shape: f32[16,128], index: 6, kind: output, shape index: {}]  }
   0x1 LB: > { %s195_s24 = sshll.u32 %s598_s1, 4  ;;  %s564_s25 = sadd.s32 4294967295, %s515_s21   ;;  %s515_s21 = sphi %s555_s21, %s17_s21   ;;  %s196_s24 = int_to_ptr.hbm [resolvable:$true] %s195_s24 }
   0x2   : > { %p439_p0 = scmp.ge.s32.totalorder %s515_s21, 1  ;;  %p184_p1 = scmp.lt.s32.totalorder %s515_s21, 3 }
   0x3   : > { %p457_p2 = scmp.eq.s32.totalorder %s564_s25, 0  ;;  %s517_s26 = smov [#allocation2]  }
   0x4   : > { %p185_p3 = pnand %p439_p0, %p184_p1  ;;  %s197_s27 = sshll.u32 %s517_s26, 4  ;;  %s198_s27 = int_to_ptr.vmem [resolvable:$true] %s197_s27 }
   0x5   : > { %s518_s28 = smov 128   ;;  %s519_s29 = smov 8  }
   0x6   : > { %p453_p4 = pneg %p185_p3  ;;  %236 = sbr.rel (%p185_p3) target bundleno = 443 (0x1bb), region = 44 }
   0x8   : > { %p454_p5 = pnand %p457_p2, %p453_p4 }
   0xa   : > { %456 = dma.hbm_to_vmem [thread:$0]  (!%p454_p5), %s196_s24, 2048, %s198_s27, [#allocation3], %s518_s28, %s518_s28, %s519_s29  }
   0xb   : > { %510 = dma.done.wait (%p457_p2), [#allocation3], 2048  }
   0xc   : > { %512 = vsyncadd (%p457_p2), [#allocation3], 4294965248  ;;  %v297_v0 = vld [vmem:[#allocation2 + $0x78] sm:$0xff]  ;;  %v296_v1 = vld [vmem:[#allocation2 + $0x70] sm:$0xff]  ;;  %p269_p6 = scmp.lt.s32.totalorder %s564_s25, 1  ;;  %v324_v17 = vlaneseq }
   0xd   : > { %302 = vmatpush.msra.mxu0 %v297_v0  ;;  %v295_v2 = vld [vmem:[#allocation2 + $0x68] sm:$0xff]  ;;  %v294_v3 = vld [vmem:[#allocation2 + $0x60] sm:$0xff]  ;;  %v293_v4 = vld [vmem:[#allocation2 + $0x58] sm:$0xff] }
   0xe   : > { %v292_v5 = vld [vmem:[#allocation2 + $0x50] sm:$0xff]  ;;  %v291_v6 = vld [vmem:[#allocation2 + $0x48] sm:$0xff]  ;;  %v290_v7 = vld [vmem:[#allocation2 + $0x40] sm:$0xff]  ;;  %s605_s25 = smov (!%p269_p6, %s564_s25), 1  ;;  %v325_v19 = vand.u32 127, %v324_v17 }
   0xf   : > { %303 = vmatpush.msra.mxu0 %v296_v1  ;;  %v289_v8 = vld [vmem:[#allocation2 + $0x38] sm:$0xff]  ;;  %v288_v9 = vld [vmem:[#allocation2 + $0x30] sm:$0xff]  ;;  %v287_v10 = vld [vmem:[#allocation2 + $0x28] sm:$0xff]  ;;  %s571_s30 = sshll.u32 %s605_s25, 3 }
  0x10   : > { %v286_v11 = vld [vmem:[#allocation2 + $0x20] sm:$0xff]  ;;  %v285_v12 = vld [vmem:[#allocation2 + $0x18] sm:$0xff]  ;;  %v284_v13 = vld [vmem:[#allocation2 + $0x10] sm:$0xff]  ;;  %s272_s9 = scalar_lea.vmem %s597_s0, %s571_s30  ;;  %s276_s14 = scalar_lea.vmem %s600_s3, %s571_s30  ;;  %vm326_vm0 = vcmp.lt.s32.totalorder %v325_v19, 32 }
  0x11   : > { %304 = vmatpush.msra.mxu0 %v295_v2  ;;  %v283_v14 = vld [vmem:[#allocation2 + $0x8] sm:$0xff]  ;;  %v282_v15 = vld [vmem:[#allocation2] sm:$0xff]  ;;  %s280_s22 = scalar_lea.vmem %s603_s6, %s571_s30 }
  0x12   : > { %v281_v16 = vld [vmem:[%s272_s9] sm:$0xff] }
  0x13   : > { %305 = vmatpush.msra.mxu0 %v294_v3  ;;  %v470_v18 = vld [vmem:[%s599_s2] ss:$0 sm:$0xff] }
  0x14   : > { %v322_v21 = vld [vmem:[%s276_s14] sm:$0xff] }
  0x15   : > { %306 = vmatpush.msra.mxu0 %v293_v4  ;;  %v471_v39 = vld [vmem:[%s601_s4] ss:$0 sm:$0xff] }
  0x16   : > { %v472_v41 = vld [vmem:[%s602_s5] ss:$0 sm:$0xff] }
  0x17   : > { %307 = vmatpush.msra.mxu0 %v292_v5 }
  0x19   : > { %308 = vmatpush.msra.mxu0 %v291_v6 }
  0x1b   : > { %309 = vmatpush.msra.mxu0 %v290_v7 }
  0x1d   : > { %310 = vmatpush.msra.mxu0 %v289_v8 }
  0x1f   : > { %311 = vmatpush.msra.mxu0 %v288_v9 }
  0x21   : > { %312 = vmatpush.msra.mxu0 %v287_v10 }
  0x23   : > { %313 = vmatpush.msra.mxu0 %v286_v11 }
  0x25   : > { %314 = vmatpush.msra.mxu0 %v285_v12 }
  0x27   : > { %315 = vmatpush.msra.mxu0 %v284_v13 }
  0x29   : > { %316 = vmatpush.msra.mxu0 %v283_v14 }
  0x2b   : > { %317 = vmatpush.msra.mxu0 %v282_v15 }
  0x2c   : > { %318 = vmatmul.f32.vlgmr.msra.gmra.mxu0 %v281_v16 }
  0xa9   : > { %v319_v20 = vpop.f32.mrf.mxu0 }
  0xaa   : > { %v320_v22 = vadd.f32 %v470_v18, %v319_v20 }
  0xac   : > { %v323_v23 = vadd.f32 %v322_v21, %v320_v22 }
  0xae   : > { %v327_v24 = vsel %vm326_vm0, %v323_v23, 0.0 }
  0xaf   : > { %328 = vadd.xlane.f32.xlu0 %v327_v24 }
 0x122   : > { %v329_v25 = vpop.xlane.xlu0 %328 }
 0x123   : > { %v330_v26 = vmul.f32 0.03125, %v329_v25 }
 0x125   : > { %v331_v27 = vsub.f32 %v327_v24, %v330_v26 }
 0x127   : > { %v332_v28 = vsel %vm326_vm0, %v331_v27, 0.0 }
 0x128   : > { %v333_v29 = vmul.f32 %v332_v28, %v332_v28 }
 0x12a   : > { %334 = vadd.xlane.f32.xlu0 %v333_v29 }
 0x19d   : > { %v335_v30 = vpop.xlane.xlu0 %334 }
 0x19e   : > { %v336_v31 = vmul.f32 0.03125, %v335_v30 }
 0x1a0   : > { %v337_v32 = vadd.f32 1e-12, %v336_v31 }
 0x1a2   : > { %473 = vrsqrt.f32 %v337_v32  ;;  %vm344_vm2 = vweird.f32 %v337_v32 }
 0x1a8   : > { %v474_v33 = vpop.eup %473 }
 0x1a9   : > { %v339_v34 = vmul.f32 %v474_v33, %v337_v32  ;;  %vm345_vm1 = vweird.f32 %v474_v33 }
 0x1aa   : > { %vm346_vm3 = vmor %vm344_vm2, %vm345_vm1 }
 0x1ab   : > { %v340_v35 = vmul.f32 %v474_v33, %v339_v34 }
 0x1ad   : > { %v341_v36 = vmul.f32 0.5, %v340_v35 }
 0x1af   : > { %v342_v37 = vsub.f32 1.5, %v341_v36 }
 0x1b1   : > { %v343_v38 = vmul.f32 %v474_v33, %v342_v37 }
 0x1b3   : > { %v347_v40 = vsel %vm346_vm3, %v474_v33, %v343_v38 }
 0x1b4   : > { %v348_v42 = vmul.f32 %v347_v40, %v332_v28 }
 0x1b6   : > { %v353_v43 = vmul.f32 %v471_v39, %v348_v42 }
 0x1b8   : > { %v358_v44 = vadd.f32 %v472_v41, %v353_v43 }
 0x1ba   : > { %359 = vst [vmem:[%s280_s22] sm:$0xff] %v358_v44 }
 0x1bb PF: > { %s17_s21 = sadd.s32 1, %s515_s21  }
 0x1bc   : > { %p14_p7 = scmp.ge.s32.totalorder %s17_s21, 4  }
 0x1be   :  { %16 = sbr.rel (!%p14_p7) target bundleno = 1 (0x1), region = 82 }
 0x1c3   :  { %379 = vsyncpa [#allocation3], 1 }
 0x1c4   :  { %381 = vsyncpa [#allocation3 + $0x1], 1 }

</bundles_post_ra>
